<compile_context>
chip_gen: v7x
topology: tpu7x:2x2x1
jax: 0.10.0
libtpu: 0.0.40
codegen_flags: <defaults>
</compile_context>

<pallas_src>
import functools

import jax
import jax.numpy as jnp
from jax.experimental import pallas as pl
from jax.experimental.pallas import tpu as pltpu


def _round_up(x, m):
    return (x + m - 1) // m * m


def _default_batch_tile(B):
    """Pick the per-step batch tile.

    Large tiles amortize the ~0.35 us per-grid-step overhead and fill the MXU
    M dimension; keeping >= 2 grid steps (>= 4 at large B) lets
    dimension_semantics=("parallel",) shard the batch across both v7x
    TensorCores.  Capped at 1024 rows -> a few MiB of streamed VMEM per step,
    far below every generation's VMEM.
    """
    if B <= 16:
        return _round_up(max(B, 8), 8)
    tb = _round_up(-(-B // 2), 8)                       # exactly-2-step tile
    if B >= 1024:                                       # prefer >= 4 steps
        tb = min(tb, max(256, _round_up(-(-B // 4), 8)))
    return min(tb, 1024)


# ----------------------------------------------------------------------------
# Pallas kernel: whole VAE forward fused (encoder, reparam sample, decoder).
# One grid step processes a TB-row batch tile; weights/biases are resident.
# ----------------------------------------------------------------------------
def _vae_forward_kernel(
    x_ref, eps_ref,
    ew1, ew2, ew3, whead,          # encoder torso + fused (mu|logvar) head
    dw1, dw2, dw3, wout,           # decoder torso + concat output head
    bias_ref,                      # (8, 256) packed biases, f32
    out_ref,                       # (TB, out_pack) packed mu|logvar|z|recon
    *, latent_dim, widths,
):
    h1, h2, h3, hw, d1, d2, d3, ow = widths
    L = latent_dim
    out_pack = out_ref.shape[-1]

    def dot(a, w_ref):
        # bf16 MXU operands, f32 accumulation.
        return jnp.dot(a.astype(jnp.bfloat16), w_ref[...],
                       preferred_element_type=jnp.float32)

    relu = lambda t: jnp.maximum(t, 0.0)          # args.activation == 'relu'
    bias = lambda row, w: bias_ref[row, :w]       # f32 bias add

    x = x_ref[...]

    # --- encoder torso: size_input -> 256 -> 128 -> 128 (zero-padded dims) ---
    h = relu(dot(x, ew1) + bias(0, h1))
    h = relu(dot(h, ew2) + bias(1, h2))
    h = relu(dot(h, ew3) + bias(2, h3))

    # --- fused variational heads (padded to 128 output lanes -> full-vreg
    #     MXU result) + reparameterized sample (f32 math) ---
    head = dot(h, whead) + bias(3, hw)            # (TB, 128): [mu|logvar|0..]
    mu = head[:, :L]
    logvar = head[:, L:2 * L]
    z = mu + jnp.exp(0.5 * logvar) * eps_ref[...]

    # --- decoder torso: latent -> 128 -> 128 -> 256 ---
    d = relu(dot(z, dw1) + bias(4, d1))
    d = relu(dot(d, dw2) + bias(5, d2))
    d = relu(dot(d, dw3) + bias(6, d3))

    # --- concatenated per-column recon heads (also padded to 128 lanes;
    #     padded columns/bias are zero so padded lanes stay 0) ---
    recon = dot(d, wout) + bias(7, ow)            # (TB, 128): [recon|0..]

    # Direct lane-slice stores into the single lane-dense packed output slab
    # mu | logvar | z | recon_slot  (avoids the 4-way concatenate's XLU
    # lane-shift / select network).
    out_ref[:, :2 * L] = head[:, :2 * L]
    out_ref[:, 2 * L:3 * L] = z
    out_ref[:, 3 * L:] = recon[:, :out_pack - 3 * L]


# ----------------------------------------------------------------------------
# Wrapper: batch-tiled pallas_call with resident weights + packed output.
# ----------------------------------------------------------------------------
def vae_forward_pallas(x, eps, params, *, batch_tile=None):
    """x: (B, size_input) f32, eps: (B, latent_dim) f32."""
    B, size_input = x.shape
    latent_dim = eps.shape[1]

    weight_keys = ("ew1", "ew2", "ew3", "whead", "dw1", "dw2", "dw3", "wout")
    weights = [params[k] for k in weight_keys]
    bias_pack = params["bias_pack"]
    widths = tuple(int(w.shape[1]) for w in weights)
    out_pack = int(params["out_pack"])            # multiple of 128 by design

    # Megacore-aware, overhead-amortizing batch tile.
    tb = batch_tile if batch_tile is not None else _default_batch_tile(B)
    b_pad = _round_up(B, tb)
    if b_pad != B:
        x = jnp.pad(x, ((0, b_pad - B), (0, 0)))
        eps = jnp.pad(eps, ((0, b_pad - B), (0, 0)))
    grid = (pl.cdiv(b_pad, tb),)

    in_specs = (
        [pl.BlockSpec((tb, size_input), lambda i: (i, 0)),   # streamed x
         pl.BlockSpec((tb, latent_dim), lambda i: (i, 0))]   # streamed eps
        + [pl.BlockSpec(w.shape, lambda i: (0, 0)) for w in weights]  # resident
        + [pl.BlockSpec(bias_pack.shape, lambda i: (0, 0))]           # resident
    )
    out_specs = pl.BlockSpec((tb, out_pack), lambda i: (i, 0))

    flops = 2 * b_pad * (
        size_input * widths[0] + widths[0] * widths[1] + widths[1] * widths[2]
        + widths[2] * widths[3] + latent_dim * widths[4]
        + widths[4] * widths[5] + widths[5] * widths[6] + widths[6] * widths[7])
    bytes_accessed = (int(x.size) * 4 + int(eps.size) * 4
                      + sum(int(w.size) * 2 for w in weights)
                      + int(bias_pack.size) * 4 + b_pad * out_pack * 4)

    kernel = functools.partial(
        _vae_forward_kernel, latent_dim=latent_dim, widths=widths)

    packed = pl.pallas_call(
        kernel,
        out_shape=jax.ShapeDtypeStruct((b_pad, out_pack), jnp.float32),
        grid=grid,
        in_specs=in_specs,
        out_specs=out_specs,
        compiler_params=pltpu.CompilerParams(
            dimension_semantics=("parallel",),
            # Footprint is a few MiB even at TB=1024; raise v5e's 16 MiB
            # default scoped-VMEM ceiling so it never constrains the tile.
            vmem_limit_bytes=48 * 1024 * 1024),
        cost_estimate=pl.CostEstimate(
            flops=flops,
            transcendentals=b_pad * latent_dim,
            bytes_accessed=bytes_accessed),
    )(x, eps, *weights, bias_pack)

    mu = packed[:B, :latent_dim]
    logvar = packed[:B, latent_dim:2 * latent_dim]
    z = packed[:B, 2 * latent_dim:3 * latent_dim]
    recon_slot = packed[:B, 3 * latent_dim:]      # zero-padded past out_dim
    return mu, logvar, z, recon_slot


# ----------------------------------------------------------------------------
# Parameter construction (deterministic; zero-padded to 128-multiples, bf16
# weights, one packed f32 bias array). Padding keeps the math identical:
# padded weight columns and bias lanes are zero, and relu(0)=0 keeps them
# inert through the torsos.
# ----------------------------------------------------------------------------
def make_params(key, size_input, latent_dim, out_dim):
    L = latent_dim
    out_pack = _round_up(3 * L + out_dim, 128)
    recon_slot = out_pack - 3 * L
    head_pad = _round_up(2 * L, 128)              # full-128-lane head matmul
    recon_pad = _round_up(recon_slot, 128)        # full-128-lane recon matmul

    # (name, fan_in, fan_out, padded_fan_in, padded_fan_out)
    layer_defs = [
        ("ew1", size_input, 200, size_input, 256),
        ("ew2", 200, 100, 256, 128),
        ("ew3", 100, 50, 128, 128),
        ("whead", 50, 2 * L, 128, head_pad),      # fused mu|logvar head
        ("dw1", L, 50, L, 128),
        ("dw2", 50, 100, 128, 128),
        ("dw3", 100, 200, 128, 256),
        ("wout", 200, out_dim, 256, recon_pad),
    ]
    bias_width = max(pfo for (_, _, _, _, pfo) in layer_defs)

    keys = jax.random.split(key, len(layer_defs))
    params = {}
    biases = []
    for k, (name, fi, fo, pfi, pfo) in zip(keys, layer_defs):
        kw, kb = jax.random.split(k)
        w = jax.random.normal(kw, (fi, fo), jnp.float32) / jnp.sqrt(
            jnp.float32(fi))
        b = 0.01 * jax.random.normal(kb, (fo,), jnp.float32)
        wp = jnp.zeros((pfi, pfo), jnp.float32).at[:fi, :fo].set(w)
        bp = jnp.zeros((bias_width,), jnp.float32).at[:fo].set(b)
        params[name] = wp.astype(jnp.bfloat16)
        biases.append(bp)
    params["bias_pack"] = jnp.stack(biases, axis=0)   # (8, 256) f32
    params["out_pack"] = out_pack                     # static Python int
    return params


# ----------------------------------------------------------------------------
# Python-level VAE.forward equivalent.
# ----------------------------------------------------------------------------
def vae_forward(x_data, eps, params, *, latent_dim, n_cat, cat_size, n_num):
    mu, logvar, z, recon_slot = vae_forward_pallas(x_data, eps, params)
    out_dim = n_cat * cat_size + n_num
    recon_flat = recon_slot[:, :out_dim]

    q_params = {"z": {"mu": mu, "logvar": logvar}}
    q_samples = {"z": z}

    # prior_z(sampling=False, evalprob=False): static standard-normal params.
    p_params = {
        "z": {
            "mu": jnp.zeros((latent_dim,), jnp.float32),
            "logvar": jnp.zeros((latent_dim,), jnp.float32),  # log(1) = 0
        }
    }
    # Split the concatenated decoder head back into per-column recon params.
    cat_logits = recon_flat[:, : n_cat * cat_size].reshape(-1, n_cat, cat_size)
    num_mean = recon_flat[:, n_cat * cat_size:]
    p_params["recon"] = {"cat_logits": cat_logits, "num_mean": num_mean}

    # TODO(synk): log_q['z'] is not evaluated (evalprob=False in forward),
    # matching the PyTorch path which discards it.
    return p_params, q_params, q_samples, []


if __name__ == "__main__":
    # Small synthetic "dataset_obj / args" configuration.
    n_cat, cat_size = 2, 3      # len(cat_cols) = 2, each with 3 categories
    n_num = 4                   # len(num_cols) = 4
    embedding_size = 4
    latent_dim = 16
    batch = 256                 # default tile -> 2 grid steps of 128 rows

    size_input = n_cat * embedding_size + n_num          # 12
    out_dim = n_cat * cat_size + n_num                   # 10 (concat heads)

    key = jax.random.PRNGKey(0)
    k_x, k_eps, k_p = jax.random.split(key, 3)

    x_data = jax.random.normal(k_x, (batch, size_input), jnp.float32)
    eps = jax.random.normal(k_eps, (batch, latent_dim), jnp.float32)
    params = make_params(k_p, size_input, latent_dim, out_dim)

    p_params, q_params, q_samples, _ = vae_forward(
        x_data, eps, params,
        latent_dim=latent_dim, n_cat=n_cat, cat_size=cat_size, n_num=n_num)

    jax.block_until_ready(
        (q_params["z"]["mu"], q_params["z"]["logvar"], q_samples["z"],
         p_params["recon"]["cat_logits"], p_params["recon"]["num_mean"]))

    assert q_params["z"]["mu"].shape == (batch, latent_dim)
    assert q_params["z"]["logvar"].shape == (batch, latent_dim)
    assert q_samples["z"].shape == (batch, latent_dim)
    assert p_params["recon"]["cat_logits"].shape == (batch, n_cat, cat_size)
    assert p_params["recon"]["num_mean"].shape == (batch, n_num)
    print("KERNEL_OK")
</pallas_src>

<mosaic_0001>
module attributes {stable_mosaic.version = 11 : i64} {
  func.func @_vae_forward_kernel(%arg0: i32, %arg1: memref<128x12xf32, #tpu.memory_space<vmem>>, %arg2: memref<128x16xf32, #tpu.memory_space<vmem>>, %arg3: memref<12x256xbf16, #tpu.memory_space<vmem>>, %arg4: memref<256x128xbf16, #tpu.memory_space<vmem>>, %arg5: memref<128x128xbf16, #tpu.memory_space<vmem>>, %arg6: memref<128x128xbf16, #tpu.memory_space<vmem>>, %arg7: memref<16x128xbf16, #tpu.memory_space<vmem>>, %arg8: memref<128x128xbf16, #tpu.memory_space<vmem>>, %arg9: memref<128x256xbf16, #tpu.memory_space<vmem>>, %arg10: memref<256x128xbf16, #tpu.memory_space<vmem>>, %arg11: memref<8x256xf32, #tpu.memory_space<vmem>>, %arg12: memref<128x128xf32, #tpu.memory_space<vmem>>) attributes {dimension_semantics = [#tpu.dimension_semantics<parallel>], iteration_bounds = array<i64: 2>, scalar_prefetch = 0 : i64, scratch_operands = 0 : i64, tpu.core_type = #tpu.core_type<tc>, window_params = [{transform_indices = @transform_0, window_bounds = array<i64: 128, 12>}, {transform_indices = @transform_1, window_bounds = array<i64: 128, 16>}, {pipeline_mode = #tpu.pipeline_mode<synchronous>, transform_indices = @transform_2, window_bounds = array<i64: 12, 256>}, {pipeline_mode = #tpu.pipeline_mode<synchronous>, transform_indices = @transform_3, window_bounds = array<i64: 256, 128>}, {pipeline_mode = #tpu.pipeline_mode<synchronous>, transform_indices = @transform_4, window_bounds = array<i64: 128, 128>}, {pipeline_mode = #tpu.pipeline_mode<synchronous>, transform_indices = @transform_5, window_bounds = array<i64: 128, 128>}, {pipeline_mode = #tpu.pipeline_mode<synchronous>, transform_indices = @transform_6, window_bounds = array<i64: 16, 128>}, {pipeline_mode = #tpu.pipeline_mode<synchronous>, transform_indices = @transform_7, window_bounds = array<i64: 128, 128>}, {pipeline_mode = #tpu.pipeline_mode<synchronous>, transform_indices = @transform_8, window_bounds = array<i64: 128, 256>}, {pipeline_mode = #tpu.pipeline_mode<synchronous>, transform_indices = @transform_9, window_bounds = array<i64: 256, 128>}, {pipeline_mode = #tpu.pipeline_mode<synchronous>, transform_indices = @transform_10, window_bounds = array<i64: 8, 256>}, {transform_indices = @transform_11, window_bounds = array<i64: 128, 128>}]} {
    %c0 = arith.constant 0 : index
    %c0_0 = arith.constant 0 : index
    %0 = vector.load %arg1[%c0, %c0_0] : memref<128x12xf32, #tpu.memory_space<vmem>>, vector<128x12xf32>
    %1 = arith.truncf %0 : vector<128x12xf32> to vector<128x12xbf16>
    %c0_1 = arith.constant 0 : index
    %c0_2 = arith.constant 0 : index
    %2 = vector.load %arg3[%c0_1, %c0_2] : memref<12x256xbf16, #tpu.memory_space<vmem>>, vector<12x256xbf16>
    %cst = arith.constant dense<0.000000e+00> : vector<128x256xf32>
    %3 = tpu.matmul %1, %2, %cst {dimension_numbers = #tpu.dot_dimension_numbers<[1], [0], [0], [1], [0, 0, 1, 1], [], []>} : vector<128x12xbf16>, vector<12x256xbf16>, vector<128x256xf32> -> vector<128x256xf32>
    %c0_3 = arith.constant 0 : index
    %c0_4 = arith.constant 0 : index
    %4 = vector.load %arg11[%c0_3, %c0_4] : memref<8x256xf32, #tpu.memory_space<vmem>>, vector<1x256xf32>
    %5 = vector.shape_cast %4 : vector<1x256xf32> to vector<256xf32>
    %6 = vector.shape_cast %5 : vector<256xf32> to vector<1x256xf32>
    %7 = vector.broadcast %6 : vector<1x256xf32> to vector<128x256xf32>
    %8 = arith.addf %3, %7 : vector<128x256xf32>
    %cst_5 = arith.constant 0.000000e+00 : f32
    %9 = vector.broadcast %cst_5 : f32 to vector<128x256xf32>
    %10 = arith.maximumf %8, %9 : vector<128x256xf32>
    %11 = arith.truncf %10 : vector<128x256xf32> to vector<128x256xbf16>
    %c0_6 = arith.constant 0 : index
    %c0_7 = arith.constant 0 : index
    %12 = vector.load %arg4[%c0_6, %c0_7] : memref<256x128xbf16, #tpu.memory_space<vmem>>, vector<256x128xbf16>
    %cst_8 = arith.constant dense<0.000000e+00> : vector<128x128xf32>
    %13 = tpu.matmul %11, %12, %cst_8 {dimension_numbers = #tpu.dot_dimension_numbers<[1], [0], [0], [1], [0, 0, 1, 1], [], []>} : vector<128x256xbf16>, vector<256x128xbf16>, vector<128x128xf32> -> vector<128x128xf32>
    %c1 = arith.constant 1 : index
    %c0_9 = arith.constant 0 : index
    %14 = vector.load %arg11[%c1, %c0_9] : memref<8x256xf32, #tpu.memory_space<vmem>>, vector<1x128xf32>
    %15 = vector.shape_cast %14 : vector<1x128xf32> to vector<128xf32>
    %16 = vector.shape_cast %15 : vector<128xf32> to vector<1x128xf32>
    %17 = vector.broadcast %16 : vector<1x128xf32> to vector<128x128xf32>
    %18 = arith.addf %13, %17 : vector<128x128xf32>
    %cst_10 = arith.constant 0.000000e+00 : f32
    %19 = vector.broadcast %cst_10 : f32 to vector<128x128xf32>
    %20 = arith.maximumf %18, %19 : vector<128x128xf32>
    %21 = arith.truncf %20 : vector<128x128xf32> to vector<128x128xbf16>
    %c0_11 = arith.constant 0 : index
    %c0_12 = arith.constant 0 : index
    %22 = vector.load %arg5[%c0_11, %c0_12] : memref<128x128xbf16, #tpu.memory_space<vmem>>, vector<128x128xbf16>
    %cst_13 = arith.constant dense<0.000000e+00> : vector<128x128xf32>
    %23 = tpu.matmul %21, %22, %cst_13 {dimension_numbers = #tpu.dot_dimension_numbers<[1], [0], [0], [1], [0, 0, 1, 1], [], []>} : vector<128x128xbf16>, vector<128x128xbf16>, vector<128x128xf32> -> vector<128x128xf32>
    %c2 = arith.constant 2 : index
    %c0_14 = arith.constant 0 : index
    %24 = vector.load %arg11[%c2, %c0_14] : memref<8x256xf32, #tpu.memory_space<vmem>>, vector<1x128xf32>
    %25 = vector.shape_cast %24 : vector<1x128xf32> to vector<128xf32>
    %26 = vector.shape_cast %25 : vector<128xf32> to vector<1x128xf32>
    %27 = vector.broadcast %26 : vector<1x128xf32> to vector<128x128xf32>
    %28 = arith.addf %23, %27 : vector<128x128xf32>
    %cst_15 = arith.constant 0.000000e+00 : f32
    %29 = vector.broadcast %cst_15 : f32 to vector<128x128xf32>
    %30 = arith.maximumf %28, %29 : vector<128x128xf32>
    %31 = arith.truncf %30 : vector<128x128xf32> to vector<128x128xbf16>
    %c0_16 = arith.constant 0 : index
    %c0_17 = arith.constant 0 : index
    %32 = vector.load %arg6[%c0_16, %c0_17] : memref<128x128xbf16, #tpu.memory_space<vmem>>, vector<128x128xbf16>
    %cst_18 = arith.constant dense<0.000000e+00> : vector<128x128xf32>
    %33 = tpu.matmul %31, %32, %cst_18 {dimension_numbers = #tpu.dot_dimension_numbers<[1], [0], [0], [1], [0, 0, 1, 1], [], []>} : vector<128x128xbf16>, vector<128x128xbf16>, vector<128x128xf32> -> vector<128x128xf32>
    %c3 = arith.constant 3 : index
    %c0_19 = arith.constant 0 : index
    %34 = vector.load %arg11[%c3, %c0_19] : memref<8x256xf32, #tpu.memory_space<vmem>>, vector<1x128xf32>
    %35 = vector.shape_cast %34 : vector<1x128xf32> to vector<128xf32>
    %36 = vector.shape_cast %35 : vector<128xf32> to vector<1x128xf32>
    %37 = vector.broadcast %36 : vector<1x128xf32> to vector<128x128xf32>
    %38 = arith.addf %33, %37 : vector<128x128xf32>
    %39 = vector.extract_strided_slice %38 {offsets = [0, 0], sizes = [128, 16], strides = [1, 1]} : vector<128x128xf32> to vector<128x16xf32>
    %40 = vector.extract_strided_slice %38 {offsets = [0, 16], sizes = [128, 16], strides = [1, 1]} : vector<128x128xf32> to vector<128x16xf32>
    %cst_20 = arith.constant 5.000000e-01 : f32
    %41 = vector.broadcast %cst_20 : f32 to vector<128x16xf32>
    %42 = arith.mulf %41, %40 : vector<128x16xf32>
    %43 = math.exp %42 : vector<128x16xf32>
    %c0_21 = arith.constant 0 : index
    %c0_22 = arith.constant 0 : index
    %44 = vector.load %arg2[%c0_21, %c0_22] : memref<128x16xf32, #tpu.memory_space<vmem>>, vector<128x16xf32>
    %45 = arith.mulf %43, %44 : vector<128x16xf32>
    %46 = arith.addf %39, %45 : vector<128x16xf32>
    %47 = arith.truncf %46 : vector<128x16xf32> to vector<128x16xbf16>
    %c0_23 = arith.constant 0 : index
    %c0_24 = arith.constant 0 : index
    %48 = vector.load %arg7[%c0_23, %c0_24] : memref<16x128xbf16, #tpu.memory_space<vmem>>, vector<16x128xbf16>
    %cst_25 = arith.constant dense<0.000000e+00> : vector<128x128xf32>
    %49 = tpu.matmul %47, %48, %cst_25 {dimension_numbers = #tpu.dot_dimension_numbers<[1], [0], [0], [1], [0, 0, 1, 1], [], []>} : vector<128x16xbf16>, vector<16x128xbf16>, vector<128x128xf32> -> vector<128x128xf32>
    %c4 = arith.constant 4 : index
    %c0_26 = arith.constant 0 : index
    %50 = vector.load %arg11[%c4, %c0_26] : memref<8x256xf32, #tpu.memory_space<vmem>>, vector<1x128xf32>
    %51 = vector.shape_cast %50 : vector<1x128xf32> to vector<128xf32>
    %52 = vector.shape_cast %51 : vector<128xf32> to vector<1x128xf32>
    %53 = vector.broadcast %52 : vector<1x128xf32> to vector<128x128xf32>
    %54 = arith.addf %49, %53 : vector<128x128xf32>
    %cst_27 = arith.constant 0.000000e+00 : f32
    %55 = vector.broadcast %cst_27 : f32 to vector<128x128xf32>
    %56 = arith.maximumf %54, %55 : vector<128x128xf32>
    %57 = arith.truncf %56 : vector<128x128xf32> to vector<128x128xbf16>
    %c0_28 = arith.constant 0 : index
    %c0_29 = arith.constant 0 : index
    %58 = vector.load %arg8[%c0_28, %c0_29] : memref<128x128xbf16, #tpu.memory_space<vmem>>, vector<128x128xbf16>
    %cst_30 = arith.constant dense<0.000000e+00> : vector<128x128xf32>
    %59 = tpu.matmul %57, %58, %cst_30 {dimension_numbers = #tpu.dot_dimension_numbers<[1], [0], [0], [1], [0, 0, 1, 1], [], []>} : vector<128x128xbf16>, vector<128x128xbf16>, vector<128x128xf32> -> vector<128x128xf32>
    %c5 = arith.constant 5 : index
    %c0_31 = arith.constant 0 : index
    %60 = vector.load %arg11[%c5, %c0_31] : memref<8x256xf32, #tpu.memory_space<vmem>>, vector<1x128xf32>
    %61 = vector.shape_cast %60 : vector<1x128xf32> to vector<128xf32>
    %62 = vector.shape_cast %61 : vector<128xf32> to vector<1x128xf32>
    %63 = vector.broadcast %62 : vector<1x128xf32> to vector<128x128xf32>
    %64 = arith.addf %59, %63 : vector<128x128xf32>
    %cst_32 = arith.constant 0.000000e+00 : f32
    %65 = vector.broadcast %cst_32 : f32 to vector<128x128xf32>
    %66 = arith.maximumf %64, %65 : vector<128x128xf32>
    %67 = arith.truncf %66 : vector<128x128xf32> to vector<128x128xbf16>
    %c0_33 = arith.constant 0 : index
    %c0_34 = arith.constant 0 : index
    %68 = vector.load %arg9[%c0_33, %c0_34] : memref<128x256xbf16, #tpu.memory_space<vmem>>, vector<128x256xbf16>
    %cst_35 = arith.constant dense<0.000000e+00> : vector<128x256xf32>
    %69 = tpu.matmul %67, %68, %cst_35 {dimension_numbers = #tpu.dot_dimension_numbers<[1], [0], [0], [1], [0, 0, 1, 1], [], []>} : vector<128x128xbf16>, vector<128x256xbf16>, vector<128x256xf32> -> vector<128x256xf32>
    %c6 = arith.constant 6 : index
    %c0_36 = arith.constant 0 : index
    %70 = vector.load %arg11[%c6, %c0_36] : memref<8x256xf32, #tpu.memory_space<vmem>>, vector<1x256xf32>
    %71 = vector.shape_cast %70 : vector<1x256xf32> to vector<256xf32>
    %72 = vector.shape_cast %71 : vector<256xf32> to vector<1x256xf32>
    %73 = vector.broadcast %72 : vector<1x256xf32> to vector<128x256xf32>
    %74 = arith.addf %69, %73 : vector<128x256xf32>
    %cst_37 = arith.constant 0.000000e+00 : f32
    %75 = vector.broadcast %cst_37 : f32 to vector<128x256xf32>
    %76 = arith.maximumf %74, %75 : vector<128x256xf32>
    %77 = arith.truncf %76 : vector<128x256xf32> to vector<128x256xbf16>
    %c0_38 = arith.constant 0 : index
    %c0_39 = arith.constant 0 : index
    %78 = vector.load %arg10[%c0_38, %c0_39] : memref<256x128xbf16, #tpu.memory_space<vmem>>, vector<256x128xbf16>
    %cst_40 = arith.constant dense<0.000000e+00> : vector<128x128xf32>
    %79 = tpu.matmul %77, %78, %cst_40 {dimension_numbers = #tpu.dot_dimension_numbers<[1], [0], [0], [1], [0, 0, 1, 1], [], []>} : vector<128x256xbf16>, vector<256x128xbf16>, vector<128x128xf32> -> vector<128x128xf32>
    %c7 = arith.constant 7 : index
    %c0_41 = arith.constant 0 : index
    %80 = vector.load %arg11[%c7, %c0_41] : memref<8x256xf32, #tpu.memory_space<vmem>>, vector<1x128xf32>
    %81 = vector.shape_cast %80 : vector<1x128xf32> to vector<128xf32>
    %82 = vector.shape_cast %81 : vector<128xf32> to vector<1x128xf32>
    %83 = vector.broadcast %82 : vector<1x128xf32> to vector<128x128xf32>
    %84 = arith.addf %79, %83 : vector<128x128xf32>
    %85 = vector.extract_strided_slice %38 {offsets = [0, 0], sizes = [128, 32], strides = [1, 1]} : vector<128x128xf32> to vector<128x32xf32>
    %c0_42 = arith.constant 0 : index
    %c0_43 = arith.constant 0 : index
    %86 = vector.load %arg12[%c0_42, %c0_43] : memref<128x128xf32, #tpu.memory_space<vmem>>, vector<128x32xf32>
    tpu.vector_store %arg12[%c0_42, %c0_43], %85 {strides = array<i32>} : memref<128x128xf32, #tpu.memory_space<vmem>>, vector<128x32xf32>,
    %c0_44 = arith.constant 0 : index
    %c32 = arith.constant 32 : index
    %87 = vector.load %arg12[%c0_44, %c32] : memref<128x128xf32, #tpu.memory_space<vmem>>, vector<128x16xf32>
    tpu.vector_store %arg12[%c0_44, %c32], %46 {strides = array<i32>} : memref<128x128xf32, #tpu.memory_space<vmem>>, vector<128x16xf32>,
    %88 = vector.extract_strided_slice %84 {offsets = [0, 0], sizes = [128, 80], strides = [1, 1]} : vector<128x128xf32> to vector<128x80xf32>
    %c0_45 = arith.constant 0 : index
    %c48 = arith.constant 48 : index
    %89 = vector.load %arg12[%c0_45, %c48] : memref<128x128xf32, #tpu.memory_space<vmem>>, vector<128x80xf32>
    tpu.vector_store %arg12[%c0_45, %c48], %88 {strides = array<i32>} : memref<128x128xf32, #tpu.memory_space<vmem>>, vector<128x80xf32>,
    return
  }
  func.func @transform_0(%arg0: i32) -> (i32, i32) {
    %c0_i32 = arith.constant 0 : i32
    %c0_i32_0 = arith.constant 0 : i32
    return %arg0, %c0_i32 : i32, i32
  }
  func.func @transform_1(%arg0: i32) -> (i32, i32) {
    %c0_i32 = arith.constant 0 : i32
    %c0_i32_0 = arith.constant 0 : i32
    return %arg0, %c0_i32 : i32, i32
  }
  func.func @transform_2(%arg0: i32) -> (i32, i32) {
    %c0_i32 = arith.constant 0 : i32
    %c0_i32_0 = arith.constant 0 : i32
    %c0_i32_1 = arith.constant 0 : i32
    return %c0_i32, %c0_i32_0 : i32, i32
  }
  func.func @transform_3(%arg0: i32) -> (i32, i32) {
    %c0_i32 = arith.constant 0 : i32
    %c0_i32_0 = arith.constant 0 : i32
    %c0_i32_1 = arith.constant 0 : i32
    return %c0_i32, %c0_i32_0 : i32, i32
  }
  func.func @transform_4(%arg0: i32) -> (i32, i32) {
    %c0_i32 = arith.constant 0 : i32
    %c0_i32_0 = arith.constant 0 : i32
    %c0_i32_1 = arith.constant 0 : i32
    return %c0_i32, %c0_i32_0 : i32, i32
  }
  func.func @transform_5(%arg0: i32) -> (i32, i32) {
    %c0_i32 = arith.constant 0 : i32
    %c0_i32_0 = arith.constant 0 : i32
    %c0_i32_1 = arith.constant 0 : i32
    return %c0_i32, %c0_i32_0 : i32, i32
  }
  func.func @transform_6(%arg0: i32) -> (i32, i32) {
    %c0_i32 = arith.constant 0 : i32
    %c0_i32_0 = arith.constant 0 : i32
    %c0_i32_1 = arith.constant 0 : i32
    return %c0_i32, %c0_i32_0 : i32, i32
  }
  func.func @transform_7(%arg0: i32) -> (i32, i32) {
    %c0_i32 = arith.constant 0 : i32
    %c0_i32_0 = arith.constant 0 : i32
    %c0_i32_1 = arith.constant 0 : i32
    return %c0_i32, %c0_i32_0 : i32, i32
  }
  func.func @transform_8(%arg0: i32) -> (i32, i32) {
    %c0_i32 = arith.constant 0 : i32
    %c0_i32_0 = arith.constant 0 : i32
    %c0_i32_1 = arith.constant 0 : i32
    return %c0_i32, %c0_i32_0 : i32, i32
  }
  func.func @transform_9(%arg0: i32) -> (i32, i32) {
    %c0_i32 = arith.constant 0 : i32
    %c0_i32_0 = arith.constant 0 : i32
    %c0_i32_1 = arith.constant 0 : i32
    return %c0_i32, %c0_i32_0 : i32, i32
  }
  func.func @transform_10(%arg0: i32) -> (i32, i32) {
    %c0_i32 = arith.constant 0 : i32
    %c0_i32_0 = arith.constant 0 : i32
    %c0_i32_1 = arith.constant 0 : i32
    return %c0_i32, %c0_i32_0 : i32, i32
  }
  func.func @transform_11(%arg0: i32) -> (i32, i32) {
    %c0_i32 = arith.constant 0 : i32
    %c0_i32_0 = arith.constant 0 : i32
    return %arg0, %c0_i32 : i32, i32
  }
}

</mosaic_0001>

<bundles_post_ra>
// kernel: tpu_custom_call.1
= control target key start
LH: loop header
LB: loop body
LE: loop exit
PB: predicated region body
PF: predicated region fallthrough
CT: control target
= control target key end

     0   :  { %16 = vsyncpa [#allocation3], 0  ;;  %s4331_s0 = inlined_call_operand.vmem [shape: f32[256,12], index: 0, kind: input, shape index: {}]   ;;  %s4332_s1 = inlined_call_operand.vmem [shape: f32[256,16], index: 1, kind: input, shape index: {}]   ;;  %s4333_s2 = inlined_call_operand.hbm [shape: bf16[12,256], index: 2, kind: input, shape index: {}]   ;;  %s4334_s3 = inlined_call_operand.vmem [shape: bf16[256,128], index: 3, kind: input, shape index: {}]   ;;  %s4335_s4 = inlined_call_operand.vmem [shape: bf16[128,128], index: 4, kind: input, shape index: {}]   ;;  %s4336_s5 = inlined_call_operand.vmem [shape: bf16[128,128], index: 5, kind: input, shape index: {}]   ;;  %s4337_s6 = inlined_call_operand.hbm [shape: bf16[16,128], index: 6, kind: input, shape index: {}]   ;;  %s4338_s7 = inlined_call_operand.vmem [shape: bf16[128,128], index: 7, kind: input, shape index: {}]   ;;  %s4339_s8 = inlined_call_operand.vmem [shape: bf16[128,256], index: 8, kind: input, shape index: {}]   ;;  %s4340_s9 = inlined_call_operand.vmem [shape: bf16[256,128], index: 9, kind: input, shape index: {}]   ;;  %s4341_s10 = inlined_call_operand.vmem [shape: f32[8,256], index: 10, kind: input, shape index: {}]   ;;  %s4342_s11 = inlined_call_operand.hbm [shape: f32[256,128], index: 11, kind: output, shape index: {}]  }
   0x1   :  { %17 = vsyncpa [#allocation6], 0 }
   0x2   :  { %18 = vsyncpa [#allocation4], 0 }
   0x3   :  { %20 = vsyncpa [#allocation4 + $0x1], 0  ;;  %s3452_s17 = smov 0   ;;  %s3454_s18 = smov 0  }
   0x4   :  { %s3456_s19 = smov 0   ;;  %s3458_s20 = smov 0  }
   0x5 LB: > { %4351 = sst [smem:[#allocation11_spill]] %s3364_s17  ;;  %s3473_s21 = sadd.s32 4294967295, %s3376_s20   ;;  %s3376_s20 = sphi %s3458_s20, %s4369_s20   ;;  %s3372_s19 = sphi %s3456_s19, %s4371_s19   ;;  %s3368_s18 = sphi %s3454_s18, %s4373_s18   ;;  %s3364_s17 = sphi %s3452_s17, %s4372_s17  }
   0x6   : > { %4352 = sst [smem:[#allocation12_spill]] %s3372_s19  ;;  %s2636_s22 = sadd.s32 4294967294, %s3376_s20  }
   0x7   : > { %s3477_s23 = sadd.s32 1, %s3376_s20   ;;  %s274_s24 = sadd.s32 1, %s3372_s19 }
   0x8   : > { %4353 = sst [smem:[#allocation13_spill]] %s3477_s23  ;;  %s271_s25 = ssub.s32 %s3376_s20, %s3477_s23 }
   0x9   : > { %p284_p0 = scmp.ne.s32.totalorder %s3372_s19, %s3368_s18  ;;  %p272_p1 = scmp.eq.s32.totalorder %s271_s25, 0 }
   0xa   : > { %p285_p2 = scmp.eq.s32.totalorder %s3473_s21, 1  ;;  %p290_p3 = scmp.ne.s32.totalorder %s3368_s18, %s3364_s17 }
   0xb   : > { %p291_p4 = scmp.eq.s32.totalorder %s2636_s22, 1  ;;  %p2637_p7 = scmp.ge.s32.totalorder %s3376_s20, 1 }
   0xc   : > { %s3488_s26 = scalar_select %p272_p1, %s3372_s19, %s274_s24  }
   0xd   : > { %p3490_p5 = por %p285_p2, %p284_p0  ;;  %p3494_p6 = por %p291_p4, %p290_p3 }
   0xe   : > { %4354 = sst [smem:[#allocation14_spill]] %s3488_s26  ;;  %p298_p8 = scmp.lt.s32.totalorder %s3376_s20, 3 }
   0xf   : > { %s4355_s27 = scalar_select %p3490_p5, 1, 0 }
  0x10   : > { %s4356_s28 = scalar_select %p3494_p6, 1, 0 }
  0x11   : > { %p4344_p9 = scmp.eq.s32.totalorder %s3473_s21, 0  ;;  %p3501_p10 = pnand %p2637_p7, %p298_p8 }
  0x12   : > { %4357 = sst [smem:[#allocation15_spill]] %s4356_s28  ;;  %s3378_s30 = smov [#allocation2]  }
  0x13   : > { %s4358_s29 = scalar_select %p3501_p10, 1, 0 }
  0x14   : > { %s310_s12 = sshll.u32 %s3378_s30, 4  ;;  %p3073_p11 = pneg %p3501_p10  ;;  %s311_s12 = int_to_ptr.vmem [resolvable:$true] %s310_s12 }
  0x15   : > { %s3379_s14 = smov [#allocation5]   ;;  %s3250_s24 = scalar_lea.hbm %s4333_s2, 256 }
  0x16   : > { %p3509_p12 = pnand %p4344_p9, %p3073_p11  ;;  %s332_s15 = sshll.u32 %s3379_s14, 4  ;;  %s3513_s15 = int_to_ptr.vmem [resolvable:$true] %s332_s15 }
  0x17   : > { %p3251_p13 = scmp.ne.s32.totalorder %s4333_s2, %s3250_s24  ;;  %p3257_p3 = scmp.lt.u32.totalorder %s3250_s24, %s4333_s2 }
  0x18   : > { %p3252_p0 = pneg %p3509_p12 }
  0x1a   : > { %p3253_p1 = pnand %p3252_p0, %p3251_p13 }
  0x1c   : > { %p3254_p2 = pneg %p3253_p1 }
  0x1e   : > { %p3259_p4 = pnand %p3257_p3, %p3254_p2 }
  0x20   : > { %3262 = shalt.err (!%p3259_p4)
}
  0x21   : > { %s3263_s14 = scalar_lea.vmem %s311_s12, 256  ;;  %p3271_p9 = scmp.lt.s32.totalorder %s311_s12, %s311_s12 }
  0x22   : > { %p3264_p7 = scmp.ne.s32.totalorder %s311_s12, %s3263_s14  ;;  %p3272_p6 = scmp.lt.s32.totalorder %s3263_s14, %s3263_s14 }
  0x24   : > { %p3266_p8 = pnand %p3264_p7, %p3252_p0  ;;  %p3273_p5 = por %p3272_p6, %p3271_p9 }
  0x26   : > { %p3267_p11 = pneg %p3266_p8 }
  0x28   : > { %p3274_p10 = pnand %p3273_p5, %p3267_p11 }
  0x2a   : > { %3277 = shalt.err (!%p3274_p10)
}
  0x2b   : > { %s3380_s16 = smov 128   ;;  %s3381_s22 = smov 8  }
  0x2c   : > { %3076 = dma.hbm_to_vmem [thread:$0]  (!%p3509_p12), %s4333_s2, 256, %s311_s12, [#allocation3], %s3380_s16, %s3380_s16, %s3381_s22  }
  0x2d   : > { %s3278_s30 = scalar_lea.hbm %s4337_s6, 128 }
  0x2e   : > { %p3279_p13 = scmp.ne.s32.totalorder %s4337_s6, %s3278_s30  ;;  %p3285_p9 = scmp.lt.u32.totalorder %s3278_s30, %s4337_s6 }
  0x30   : > { %p3281_p5 = pnand %p3279_p13, %p3252_p0 }
  0x32   : > { %p3282_p6 = pneg %p3281_p5 }
  0x34   : > { %p3287_p10 = pnand %p3285_p9, %p3282_p6 }
  0x36   : > { %3290 = shalt.err (!%p3287_p10)
}
  0x37   : > { %s3291_s12 = scalar_lea.vmem %s3513_s15, 128  ;;  %p3299_p4 = scmp.lt.s32.totalorder %s3513_s15, %s3513_s15 }
  0x38   : > { %p3292_p1 = scmp.ne.s32.totalorder %s3513_s15, %s3291_s12  ;;  %p3300_p7 = scmp.lt.s32.totalorder %s3291_s12, %s3291_s12 }
  0x3a   : > { %p3294_p2 = pnand %p3292_p1, %p3252_p0  ;;  %p3301_p8 = por %p3300_p7, %p3299_p4 }
  0x3c   : > { %p3295_p3 = pneg %p3294_p2 }
  0x3e   : > { %p3302_p11 = pnand %p3301_p8, %p3295_p3 }
  0x40   : > { %3305 = shalt.err (!%p3302_p11)
}
  0x41   : > { %s3382_s17 = smov 64   ;;  %s3383_s23 = smov 4  }
  0x42   : > { %3079 = dma.hbm_to_vmem [thread:$0]  (!%p3509_p12), %s4337_s6, 128, %s3513_s15, [#allocation6], %s3382_s17, %s3382_s17, %s3383_s23  }
  0x43   : > { %p4360_p13 = scmp.ne.s32.totalorder %s4358_s29, 0 }
  0x44   : > { %p4361_p0 = scmp.eq.s32.totalorder (!%p4360_p13), %s3473_s21, 0 }
  0x45   : > { %378 = sbr.rel (%p4360_p13) target bundleno = 2191 (0x88f), region = 64 }
  0x4c   : > { %3351 = dma.done.wait (%p4361_p0), [#allocation3], 256   ;;  %p4362_p5 = pmov %p4361_p0 }
  0x4d   : > { %p4363_p6 = pmov %p4361_p0 }
  0x4e   : > { %3353 = vsyncadd (%p4362_p5), [#allocation3], 4294967040 }
  0x4f   : > { %3355 = dma.done.wait (%p4363_p6), [#allocation6], 128   ;;  %p4364_p9 = pmov %p4361_p0 }
  0x50   : > { %s2645_s13 = sshll.u32 %s3473_s21, 4  ;;  %v3384_v0 = vmov 0   ;;  %vm512_vm0 = vcmask 1045504   ;;  %v3134_v1 = vld [vmem:[#allocation2 + $0x4] ss:$8 sps:$4 sm:$0x3f]   ;;  %v469_v50 = vlaneseq }
  0x51   : > { %3357 = vsyncadd (%p4364_p9), [#allocation6], 4294967168  ;;  %551 = vmatprep.mubr.bf16.mxu0 %v3384_v0  ;;  %p428_p12 = scmp.lt.s32.totalorder %s2645_s13, 31  ;;  %v3136_v2 = vld [vmem:[#allocation2] ss:$8 sps:$4 sm:$0x3f]   ;;  %2651 = vmatprep.subr.msk.bf16.mxu0 %vm512_vm0, %v3134_v1 }
  0x52   : > { %v514_v5 = vsel %vm512_vm0, %v3136_v2, 0  ;;  %vm487_vm1 = vcmask 97280   ;;  %v3137_v9 = vld [vmem:[%s4334_s3 + $0x40] sm:$0xff]   ;;  %v3139_v11 = vld [vmem:[%s4334_s3 + $0x48] sm:$0xff]   ;;  %v3141_v14 = vld [vmem:[%s4334_s3 + $0x50] sm:$0xff]   ;;  %v3681_v51 = vshrl.u32 %v469_v50, 7 }
  0x53   : > { %s4375_s13 = smov (!%p428_p12, %s2645_s13), 31  ;;  %520 = vmatpush1.bf16.msra.mxu0 %v514_v5  ;;  %v3138_v10 = vld [vmem:[%s4334_s3] sm:$0xff]   ;;  %2748 = vmatprep.subr.bf16.mxu1 %v3137_v9  ;;  %v3140_v12 = vld [vmem:[%s4334_s3 + $0x8] sm:$0xff]   ;;  %v3142_v16 = vld [vmem:[%s4334_s3 + $0x10] sm:$0xff]   ;;  %s3385_s23 = smov 16   ;;  %vm2347_vm2 = vcmask 261120  }
  0x54   : > { %s2646_s29 = sshll.u32 %s4375_s13, 3  ;;  %2749 = vmatpush3.bf16.msra.mxu1 %v3138_v10  ;;  %v3143_v17 = vld [vmem:[%s4334_s3 + $0x58] sm:$0xff]   ;;  %v3145_v20 = vld [vmem:[%s4334_s3 + $0x60] sm:$0xff]   ;;  %v3147_v23 = vld [vmem:[%s4334_s3 + $0x68] sm:$0xff]   ;;  %v471_v52 = vsub.s32 0, %v3681_v51  ;;  %v475_v54 = vsub.s32 1, %v3681_v51 }
  0x55   : > { %s3582_s19 = scalar_lea.vmem %s4331_s0, %s2646_s29  ;;  %2750 = vmatprep.subr.bf16.mxu1 %v3139_v11  ;;  %v3144_v19 = vld [vmem:[%s4334_s3 + $0x18] sm:$0xff]   ;;  %v3146_v22 = vld [vmem:[%s4334_s3 + $0x20] sm:$0xff]   ;;  %v3148_v39 = vld [vmem:[%s4334_s3 + $0x28] sm:$0xff]   ;;  %s3784_s17 = scalar_lea.vmem %s4332_s1, %s2646_s29  ;;  %vm1519_vm3 = vcmask 130048   ;;  %vm2428_vm4 = vcmask 392448   ;;  %vm2509_vm5 = vcmask 1047936  }
  0x56   : > { %v441_v3 = vld [vmem:[%s3582_s19] sm:$0xff]  ;;  %v442_v4 = vld [vmem:[%s3582_s19 + $0x8] sm:$0xff]  ;;  %v443_v7 = vld [vmem:[%s3582_s19 + $0x10] sm:$0xff]  ;;  %s424_s28 = sand.u32 1, %s3368_s18   ;;  %s3386_s24 = smov 112  }
  0x57   : > { %v457_v6 = vpack.c.bf16 %v442_v4, %v441_v3  ;;  %v444_v8 = vld [vmem:[%s3582_s19 + $0x18] sm:$0xff]  ;;  %v445_v15 = vld [vmem:[%s3582_s19 + $0x20] sm:$0xff]  ;;  %v446_v18 = vld [vmem:[%s3582_s19 + $0x28] sm:$0xff]  ;;  %s2644_s16 = sshll.u32 %s424_s28, 7  ;;  %s3387_s25 = smov 32  }
  0x58   : > { %v458_v13 = vpack.c.bf16 %v444_v8, %v443_v7  ;;  %2751 = vmatpush3.bf16.msra.mxu1 %v3140_v12  ;;  %v459_v21 = vpack.c.bf16 %v446_v18, %v445_v15  ;;  %v447_v24 = vld [vmem:[%s3582_s19 + $0x30] sm:$0xff]  ;;  %v448_v25 = vld [vmem:[%s3582_s19 + $0x38] sm:$0xff]  ;;  %v449_v27 = vld [vmem:[%s3582_s19 + $0x40] sm:$0xff]  ;;  %s3820_s26 = scalar_lea.vmem [#allocation7], %s2644_s16  ;;  %s3388_s22 = smov 48  }
  0x59   : > { %2652 = vmatmul.mubr.msk.bf16.vlgmr.msra.gmra.mrb[0].mxu0 %vm487_vm1, %v457_v6  ;;  %2752 = vmatprep.subr.bf16.mxu1 %v3141_v14  ;;  %v460_v26 = vpack.c.bf16 %v448_v25, %v447_v24  ;;  %v450_v28 = vld [vmem:[%s3582_s19 + $0x48] sm:$0xff]  ;;  %v451_v30 = vld [vmem:[%s3582_s19 + $0x50] sm:$0xff]  ;;  %v452_v31 = vld [vmem:[%s3582_s19 + $0x58] sm:$0xff]  ;;  %s2540_s30 = sshll.u32 %s3820_s26, 4  ;;  %s4290_s12 = scalar_lea.sflag [#allocation4], %s424_s28  ;;  %s4282_s30 = int_to_ptr.vmem [resolvable:$true] %s2540_s30 }
  0x5a   : > { %561 = vmatprep.mubr.bf16.mxu0 %v3384_v0  ;;  %v461_v29 = vpack.c.bf16 %v450_v28, %v449_v27  ;;  %v462_v32 = vpack.c.bf16 %v452_v31, %v451_v30  ;;  %v453_v33 = vld [vmem:[%s3582_s19 + $0x60] sm:$0xff]  ;;  %v454_v34 = vld [vmem:[%s3582_s19 + $0x68] sm:$0xff]  ;;  %v455_v36 = vld [vmem:[%s3582_s19 + $0x70] sm:$0xff]  ;;  %p4365_p1 = scmp.ne.s32.totalorder %s4355_s27, 0 }
  0x5b   : > { %v463_v35 = vpack.c.bf16 %v454_v34, %v453_v33  ;;  %v456_v37 = vld [vmem:[%s3582_s19 + $0x78] sm:$0xff]  ;;  %v3149_v40 = vld [vmem:[%s4334_s3 + $0x70] sm:$0xff]   ;;  %v3153_v44 = vld [vmem:[%s4335_s4] sm:$0xff]  }
  0x5c   : > { %2753 = vmatpush3.bf16.msra.mxu1 %v3142_v16  ;;  %v464_v38 = vpack.c.bf16 %v456_v37, %v455_v36  ;;  %v3150_v41 = vld [vmem:[%s4334_s3 + $0x30] sm:$0xff]   ;;  %v3151_v42 = vld [vmem:[%s4334_s3 + $0x78] sm:$0xff]   ;;  %v3154_v45 = vld [vmem:[%s4335_s4 + $0x8] sm:$0xff]   ;;  %2933 = vmatprep.subr.bf16.mxu0 %v3153_v44 }
  0x5d   : > { %2754 = vmatprep.subr.bf16.mxu1 %v3143_v17  ;;  %v3152_v43 = vld [vmem:[%s4334_s3 + $0x38] sm:$0xff]   ;;  %2934 = vmatpush3.bf16.msra.mxu0 %v3153_v44  ;;  %v3155_v46 = vld [vmem:[%s4335_s4 + $0x10] sm:$0xff]   ;;  %v3157_v48 = vld [vmem:[%s4335_s4 + $0x20] sm:$0xff]  }
  0x5e   : > { %2935 = vmatprep.subr.bf16.mxu0 %v3154_v45  ;;  %v3156_v47 = vld [vmem:[%s4335_s4 + $0x18] sm:$0xff]   ;;  %v3158_v49 = vld [vmem:[%s4335_s4 + $0x28] sm:$0xff]  }
  0x5f   : > { %v467_v53 = vld [vmem:[%s4341_s10] ss:$8 sm:$0x3] }
  0x60   : > { %2755 = vmatpush3.bf16.msra.mxu1 %v3144_v19  ;;  %v3690_v55 = vrot.slane %v467_v53, %v471_v52  ;;  %v3694_v56 = vrot.slane %v467_v53, %v475_v54 }
  0x61   : > { %2653 = vmatmul.mubr.msk.bf16.gmra.mrb[4].mxu0 %vm487_vm1, %v458_v13  ;;  %2756 = vmatprep.subr.bf16.mxu1 %v3145_v20 }
  0x62   : > { %571 = vmatprep.mubr.bf16.mxu0 %v3384_v0  ;;  %2936 = vmatpush3.bf16.msra.mxu0 %v3154_v45 }
  0x63   : > { %2937 = vmatprep.subr.bf16.mxu0 %v3155_v46 }
  0x64   : > { %2757 = vmatpush3.bf16.msra.mxu1 %v3146_v22 }
  0x65   : > { %2758 = vmatprep.subr.bf16.mxu1 %v3147_v23 }
  0x66   : > { %2938 = vmatpush3.bf16.msra.mxu0 %v3155_v46 }
  0x67   : > { %2939 = vmatprep.subr.bf16.mxu0 %v3156_v47 }
  0x68   : > { %2759 = vmatpush3.bf16.msra.mxu1 %v3148_v39 }
  0x69   : > { %2654 = vmatmul.mubr.msk.bf16.gmra.mrb[8].mxu0 %vm487_vm1, %v459_v21  ;;  %2760 = vmatprep.subr.bf16.mxu1 %v3149_v40 }
  0x6a   : > { %581 = vmatprep.mubr.bf16.mxu0 %v3384_v0  ;;  %2940 = vmatpush3.bf16.msra.mxu0 %v3156_v47 }
  0x6b   : > { %2941 = vmatprep.subr.bf16.mxu0 %v3157_v48 }
  0x6c   : > { %2761 = vmatpush3.bf16.msra.mxu1 %v3150_v41 }
  0x6d   : > { %2762 = vmatprep.subr.bf16.mxu1 %v3151_v42 }
  0x6e   : > { %2942 = vmatpush3.bf16.msra.mxu0 %v3157_v48 }
  0x6f   : > { %2943 = vmatprep.subr.bf16.mxu0 %v3158_v49 }
  0x70   : > { %2763 = vmatpush3.bf16.msra.mxu1 %v3152_v43 }
  0x71   : > { %2655 = vmatmul.mubr.msk.bf16.gmra.mrb[12].mxu0 %vm487_vm1, %v460_v26 }
  0x72   : > { %591 = vmatprep.mubr.bf16.mxu0 %v3384_v0  ;;  %2944 = vmatpush3.bf16.msra.mxu0 %v3158_v49 }
  0x79   : > { %2656 = vmatmul.mubr.msk.bf16.gmra.mrb[16].mxu0 %vm487_vm1, %v461_v29 }
  0x7a   : > { %601 = vmatprep.mubr.bf16.mxu0 %v3384_v0 }
  0x81   : > { %2657 = vmatmul.mubr.msk.bf16.gmra.mrb[20].mxu0 %vm487_vm1, %v462_v32 }
  0x82   : > { %611 = vmatprep.mubr.bf16.mxu0 %v3384_v0 }
  0x89   : > { %2658 = vmatmul.mubr.msk.bf16.gmra.mrb[24].mxu0 %vm487_vm1, %v463_v35 }
  0x8a   : > { %621 = vmatprep.mubr.bf16.mxu0 %v3384_v0 }
  0x91   : > { %2659 = vmatmul.mubr.msk.bf16.gmra.mrb[28].mxu0 %vm487_vm1, %v464_v38 }
 0x12c   : > { %v553_v57 = vpop.f32.mrb[0].mxu0 }
 0x12d   : > { %v554_v58 = vadd.f32 %v553_v57, %v3690_v55  ;;  %v555_v59 = vpop.f32.mrb[1].mxu0 }
 0x12e   : > { %v556_v60 = vadd.f32 %v555_v59, %v3694_v56  ;;  %v557_v61 = vpop.f32.mrb[2].mxu0 }
 0x12f   : > { %v558_v62 = vadd.f32 %v557_v61, %v3690_v55  ;;  %v559_v63 = vpop.f32.mrb[3].mxu0  ;;  %v632_v2 = vmax.f32 %v554_v58, 0.0 }
 0x130   : > { %v560_v1 = vadd.f32 %v559_v63, %v3694_v56  ;;  %v633_v4 = vmax.f32 %v556_v60, 0.0 }
 0x131   : > { %v634_v3 = vmax.f32 %v558_v62, 0.0 }
 0x132   : > { %v635_v5 = vmax.f32 %v560_v1, 0.0 }
 0x133   : > { %v664_v6 = vpack.c.bf16 %v634_v3, %v632_v2 }
 0x134   : > { %v563_v7 = vpop.f32.mrb[4].mxu0  ;;  %v665_v8 = vpack.c.bf16 %v635_v5, %v633_v4 }
 0x135   : > { %v564_v9 = vadd.f32 %v563_v7, %v3690_v55  ;;  %v565_v10 = vpop.f32.mrb[5].mxu0 }
 0x136   : > { %v566_v11 = vadd.f32 %v565_v10, %v3694_v56  ;;  %v567_v12 = vpop.f32.mrb[6].mxu0  ;;  %841 = vmatprep.mubr.bf16.mxu1 %v665_v8 }
 0x137   : > { %v568_v13 = vadd.f32 %v567_v12, %v3690_v55  ;;  %v569_v14 = vpop.f32.mrb[7].mxu0  ;;  %842 = vmatmul.mubr.bf16.vlgmr.msra.gmra.mrb[0].mxu1 %v664_v6  ;;  %v636_v16 = vmax.f32 %v564_v9, 0.0 }
 0x138   : > { %v570_v15 = vadd.f32 %v569_v14, %v3694_v56  ;;  %v637_v18 = vmax.f32 %v566_v11, 0.0 }
 0x139   : > { %v638_v17 = vmax.f32 %v568_v13, 0.0 }
 0x13a   : > { %v639_v19 = vmax.f32 %v570_v15, 0.0 }
 0x13b   : > { %v666_v20 = vpack.c.bf16 %v638_v17, %v636_v16 }
 0x13c   : > { %v667_v21 = vpack.c.bf16 %v639_v19, %v637_v18  ;;  %v573_v22 = vpop.f32.mrb[8].mxu0 }
 0x13d   : > { %v574_v23 = vadd.f32 %v573_v22, %v3690_v55  ;;  %v575_v24 = vpop.f32.mrb[9].mxu0 }
 0x13e   : > { %v576_v25 = vadd.f32 %v575_v24, %v3694_v56  ;;  %v577_v26 = vpop.f32.mrb[10].mxu0  ;;  %849 = vmatprep.mubr.bf16.mxu1 %v667_v21 }
 0x13f   : > { %v578_v27 = vadd.f32 %v577_v26, %v3690_v55  ;;  %v579_v28 = vpop.f32.mrb[11].mxu0  ;;  %850 = vmatmul.mubr.bf16.gmra.mrb[4].mxu1 %v666_v20  ;;  %v640_v30 = vmax.f32 %v574_v23, 0.0 }
 0x140   : > { %v580_v29 = vadd.f32 %v579_v28, %v3694_v56  ;;  %v641_v32 = vmax.f32 %v576_v25, 0.0 }
 0x141   : > { %v642_v31 = vmax.f32 %v578_v27, 0.0 }
 0x142   : > { %v643_v33 = vmax.f32 %v580_v29, 0.0 }
 0x143   : > { %v668_v34 = vpack.c.bf16 %v642_v31, %v640_v30 }
 0x144   : > { %v669_v35 = vpack.c.bf16 %v643_v33, %v641_v32  ;;  %v583_v36 = vpop.f32.mrb[12].mxu0 }
 0x145   : > { %v584_v37 = vadd.f32 %v583_v36, %v3690_v55  ;;  %v585_v38 = vpop.f32.mrb[13].mxu0 }
 0x146   : > { %v586_v39 = vadd.f32 %v585_v38, %v3694_v56  ;;  %v587_v40 = vpop.f32.mrb[14].mxu0  ;;  %857 = vmatprep.mubr.bf16.mxu1 %v669_v35 }
 0x147   : > { %v588_v41 = vadd.f32 %v587_v40, %v3690_v55  ;;  %v589_v42 = vpop.f32.mrb[15].mxu0  ;;  %858 = vmatmul.mubr.bf16.gmra.mrb[8].mxu1 %v668_v34  ;;  %v644_v44 = vmax.f32 %v584_v37, 0.0 }
 0x148   : > { %v590_v43 = vadd.f32 %v589_v42, %v3694_v56  ;;  %v645_v46 = vmax.f32 %v586_v39, 0.0 }
 0x149   : > { %v646_v45 = vmax.f32 %v588_v41, 0.0 }
 0x14a   : > { %v647_v47 = vmax.f32 %v590_v43, 0.0 }
 0x14b   : > { %v670_v48 = vpack.c.bf16 %v646_v45, %v644_v44 }
 0x14c   : > { %v671_v49 = vpack.c.bf16 %v647_v47, %v645_v46  ;;  %v593_v50 = vpop.f32.mrb[16].mxu0 }
 0x14d   : > { %v594_v53 = vadd.f32 %v593_v50, %v3690_v55  ;;  %v595_v57 = vpop.f32.mrb[17].mxu0  ;;  %v3163_v50 = vld [vmem:[%s4336_s5 + $0x10] sm:$0xff]  }
 0x14e   : > { %v596_v58 = vadd.f32 %v595_v57, %v3694_v56  ;;  %v597_v59 = vpop.f32.mrb[18].mxu0  ;;  %865 = vmatprep.mubr.bf16.mxu1 %v671_v49  ;;  %v3162_v49 = vld [vmem:[%s4336_s5 + $0x8] sm:$0xff]   ;;  %v3165_v57 = vld [vmem:[%s4336_s5 + $0x20] sm:$0xff]  }
 0x14f   : > { %v598_v60 = vadd.f32 %v597_v59, %v3690_v55  ;;  %v599_v61 = vpop.f32.mrb[19].mxu0  ;;  %866 = vmatmul.mubr.bf16.gmra.mrb[12].mxu1 %v670_v48  ;;  %v648_v63 = vmax.f32 %v594_v53, 0.0  ;;  %v3159_v48 = vld [vmem:[%s4335_s4 + $0x30] sm:$0xff]   ;;  %v3164_v53 = vld [vmem:[%s4336_s5 + $0x18] sm:$0xff]  }
 0x150   : > { %v600_v62 = vadd.f32 %v599_v61, %v3694_v56  ;;  %v649_v2 = vmax.f32 %v596_v58, 0.0  ;;  %2945 = vmatprep.subr.bf16.mxu0 %v3159_v48  ;;  %v3166_v58 = vld [vmem:[%s4336_s5 + $0x28] sm:$0xff]   ;;  %v3167_v59 = vld [vmem:[%s4336_s5 + $0x30] sm:$0xff]   ;;  %v3758_v61 = vld [vmem:[%s4341_s10 + $0x1] ss:$0 sm:$0xff] }
 0x151   : > { %v650_v1 = vmax.f32 %v598_v60, 0.0  ;;  %2946 = vmatpush3.bf16.msra.mxu0 %v3159_v48 }
 0x152   : > { %v651_v3 = vmax.f32 %v600_v62, 0.0 }
 0x153   : > { %v672_v4 = vpack.c.bf16 %v650_v1, %v648_v63 }
 0x154   : > { %v673_v5 = vpack.c.bf16 %v651_v3, %v649_v2  ;;  %v603_v6 = vpop.f32.mrb[20].mxu0 }
 0x155   : > { %v604_v7 = vadd.f32 %v603_v6, %v3690_v55  ;;  %v605_v8 = vpop.f32.mrb[21].mxu0 }
 0x156   : > { %v606_v9 = vadd.f32 %v605_v8, %v3694_v56  ;;  %v607_v10 = vpop.f32.mrb[22].mxu0  ;;  %873 = vmatprep.mubr.bf16.mxu1 %v673_v5 }
 0x157   : > { %v608_v11 = vadd.f32 %v607_v10, %v3690_v55  ;;  %v609_v12 = vpop.f32.mrb[23].mxu0  ;;  %874 = vmatmul.mubr.bf16.gmra.mrb[16].mxu1 %v672_v4  ;;  %v652_v14 = vmax.f32 %v604_v7, 0.0 }
 0x158   : > { %v610_v13 = vadd.f32 %v609_v12, %v3694_v56  ;;  %v653_v16 = vmax.f32 %v606_v9, 0.0 }
 0x159   : > { %v654_v15 = vmax.f32 %v608_v11, 0.0 }
 0x15a   : > { %v655_v17 = vmax.f32 %v610_v13, 0.0 }
 0x15b   : > { %v674_v18 = vpack.c.bf16 %v654_v15, %v652_v14 }
 0x15c   : > { %v675_v19 = vpack.c.bf16 %v655_v17, %v653_v16  ;;  %v613_v20 = vpop.f32.mrb[24].mxu0 }
 0x15d   : > { %v614_v21 = vadd.f32 %v613_v20, %v3690_v55  ;;  %v615_v22 = vpop.f32.mrb[25].mxu0 }
 0x15e   : > { %v616_v23 = vadd.f32 %v615_v22, %v3694_v56  ;;  %v617_v24 = vpop.f32.mrb[26].mxu0  ;;  %881 = vmatprep.mubr.bf16.mxu1 %v675_v19 }
 0x15f   : > { %v618_v25 = vadd.f32 %v617_v24, %v3690_v55  ;;  %v619_v26 = vpop.f32.mrb[27].mxu0  ;;  %882 = vmatmul.mubr.bf16.gmra.mrb[20].mxu1 %v674_v18  ;;  %v656_v28 = vmax.f32 %v614_v21, 0.0 }
 0x160   : > { %v620_v27 = vadd.f32 %v619_v26, %v3694_v56  ;;  %v657_v30 = vmax.f32 %v616_v23, 0.0 }
 0x161   : > { %v658_v29 = vmax.f32 %v618_v25, 0.0 }
 0x162   : > { %v659_v31 = vmax.f32 %v620_v27, 0.0 }
 0x163   : > { %v676_v32 = vpack.c.bf16 %v658_v29, %v656_v28 }
 0x164   : > { %v677_v33 = vpack.c.bf16 %v659_v31, %v657_v30  ;;  %v623_v34 = vpop.f32.mrb[28].mxu0 }
 0x165   : > { %v624_v35 = vadd.f32 %v623_v34, %v3690_v55  ;;  %v625_v36 = vpop.f32.mrb[29].mxu0 }
 0x166   : > { %v626_v37 = vadd.f32 %v625_v36, %v3694_v56  ;;  %v627_v38 = vpop.f32.mrb[30].mxu0  ;;  %889 = vmatprep.mubr.bf16.mxu1 %v677_v33 }
 0x167   : > { %v628_v39 = vadd.f32 %v627_v38, %v3690_v55  ;;  %v629_v40 = vpop.f32.mrb[31].mxu0  ;;  %890 = vmatmul.mubr.bf16.gmra.mrb[24].mxu1 %v676_v32  ;;  %v660_v42 = vmax.f32 %v624_v35, 0.0  ;;  %v3160_v55 = vld [vmem:[%s4335_s4 + $0x38] sm:$0xff]  }
 0x168   : > { %v630_v41 = vadd.f32 %v629_v40, %v3694_v56  ;;  %v661_v44 = vmax.f32 %v626_v37, 0.0  ;;  %2947 = vmatprep.subr.bf16.mxu0 %v3160_v55  ;;  %v3161_v56 = vld [vmem:[%s4336_s5] sm:$0xff]  }
 0x169   : > { %v662_v43 = vmax.f32 %v628_v39, 0.0  ;;  %2948 = vmatpush3.bf16.msra.mxu0 %v3160_v55  ;;  %2965 = vmatprep.subr.bf16.mxu1 %v3161_v56 }
 0x16a   : > { %v663_v45 = vmax.f32 %v630_v41, 0.0  ;;  %2966 = vmatpush3.bf16.msra.mxu1 %v3161_v56 }
 0x16b   : > { %v678_v46 = vpack.c.bf16 %v662_v43, %v660_v42  ;;  %2967 = vmatprep.subr.bf16.mxu1 %v3162_v49 }
 0x16c   : > { %v679_v47 = vpack.c.bf16 %v663_v45, %v661_v44 }
 0x16e   : > { %897 = vmatprep.mubr.bf16.mxu1 %v679_v47  ;;  %2968 = vmatpush3.bf16.msra.mxu1 %v3162_v49 }
 0x16f   : > { %898 = vmatmul.mubr.bf16.gmra.mrb[28].mxu1 %v678_v46  ;;  %2969 = vmatprep.subr.bf16.mxu1 %v3163_v50 }
 0x172   : > { %2970 = vmatpush3.bf16.msra.mxu1 %v3163_v50 }
 0x173   : > { %2971 = vmatprep.subr.bf16.mxu1 %v3164_v53 }
 0x176   : > { %2972 = vmatpush3.bf16.msra.mxu1 %v3164_v53 }
 0x177   : > { %2973 = vmatprep.subr.bf16.mxu1 %v3165_v57 }
 0x17a   : > { %2974 = vmatpush3.bf16.msra.mxu1 %v3165_v57 }
 0x17b   : > { %2975 = vmatprep.subr.bf16.mxu1 %v3166_v58 }
 0x17e   : > { %2976 = vmatpush3.bf16.msra.mxu1 %v3166_v58 }
 0x17f   : > { %2977 = vmatprep.subr.bf16.mxu1 %v3167_v59 }
 0x182   : > { %2978 = vmatpush3.bf16.msra.mxu1 %v3167_v59 }
 0x20a   : > { %v2764_v60 = vpop.f32.mrb[0].mxu1 }
 0x20b   : > { %v2765_v62 = vpop.f32.mrb[1].mxu1 }
 0x20c   : > { %v2766_v63 = vadd.f32 %v2765_v62, %v2764_v60  ;;  %v2767_v1 = vpop.f32.mrb[2].mxu1 }
 0x20d   : > { %v2768_v2 = vpop.f32.mrb[3].mxu1 }
 0x20e   : > { %v844_v3 = vadd.f32 %v2766_v63, %v3758_v61  ;;  %v2769_v4 = vadd.f32 %v2768_v2, %v2767_v1 }
 0x210   : > { %v847_v5 = vadd.f32 %v2769_v4, %v3758_v61  ;;  %v906_v6 = vmax.f32 %v844_v3, 0.0 }
 0x212   : > { %v907_v7 = vmax.f32 %v847_v5, 0.0  ;;  %v2770_v8 = vpop.f32.mrb[4].mxu1 }
 0x213   : > { %v2771_v9 = vpop.f32.mrb[5].mxu1 }
 0x214   : > { %v2772_v10 = vadd.f32 %v2771_v9, %v2770_v8  ;;  %v2773_v11 = vpop.f32.mrb[6].mxu1  ;;  %v922_v12 = vpack.c.bf16 %v907_v7, %v906_v6 }
 0x215   : > { %v2774_v13 = vpop.f32.mrb[7].mxu1 }
 0x216   : > { %v852_v14 = vadd.f32 %v2772_v10, %v3758_v61  ;;  %v2775_v15 = vadd.f32 %v2774_v13, %v2773_v11  ;;  %2949 = vmatprep.mubr.bf16.mxu0 %v922_v12 }
 0x218   : > { %v855_v16 = vadd.f32 %v2775_v15, %v3758_v61  ;;  %v908_v17 = vmax.f32 %v852_v14, 0.0 }
 0x21a   : > { %v909_v18 = vmax.f32 %v855_v16, 0.0  ;;  %v2776_v19 = vpop.f32.mrb[8].mxu1 }
 0x21b   : > { %v2777_v20 = vpop.f32.mrb[9].mxu1 }
 0x21c   : > { %v923_v21 = vpack.c.bf16 %v909_v18, %v908_v17  ;;  %v2778_v22 = vadd.f32 %v2777_v20, %v2776_v19  ;;  %v2779_v23 = vpop.f32.mrb[10].mxu1 }
 0x21d   : > { %v2780_v24 = vpop.f32.mrb[11].mxu1 }
 0x21e   : > { %v860_v25 = vadd.f32 %v2778_v22, %v3758_v61  ;;  %v2781_v26 = vadd.f32 %v2780_v24, %v2779_v23  ;;  %2950 = vmatmul.mubr.bf16.vlgmr.msra.gmra.mrb[32].mxu0 %v923_v21 }
 0x220   : > { %v863_v27 = vadd.f32 %v2781_v26, %v3758_v61  ;;  %v910_v28 = vmax.f32 %v860_v25, 0.0 }
 0x222   : > { %v911_v29 = vmax.f32 %v863_v27, 0.0  ;;  %v2782_v30 = vpop.f32.mrb[12].mxu1  ;;  %v3168_v27 = vld [vmem:[%s4336_s5 + $0x38] sm:$0xff]  }
 0x223   : > { %v2783_v31 = vpop.f32.mrb[13].mxu1  ;;  %2979 = vmatprep.subr.bf16.mxu1 %v3168_v27 }
 0x224   : > { %v2784_v32 = vadd.f32 %v2783_v31, %v2782_v30  ;;  %v2785_v33 = vpop.f32.mrb[14].mxu1  ;;  %v924_v34 = vpack.c.bf16 %v911_v29, %v910_v28  ;;  %2980 = vmatpush3.bf16.msra.mxu1 %v3168_v27  ;;  %v1326_v28 = vld [vmem:[%s3784_s17] sm:$0xff]  ;;  %v1329_v29 = vld [vmem:[%s3784_s17 + $0x18] sm:$0xff]  ;;  %v1327_v30 = vld [vmem:[%s3784_s17 + $0x8] sm:$0xff] }
 0x225   : > { %v2786_v35 = vpop.f32.mrb[15].mxu1  ;;  %1358 = vrot.lane.b32.xlu0 %v1326_v28, %s3385_s23  ;;  %v1330_v31 = vld [vmem:[%s3784_s17 + $0x20] sm:$0xff] }
 0x226   : > { %v868_v36 = vadd.f32 %v2784_v32, %v3758_v61  ;;  %v2787_v37 = vadd.f32 %v2786_v35, %v2785_v33  ;;  %2953 = vmatprep.mubr.bf16.mxu0 %v924_v34  ;;  %v1331_v32 = vld [vmem:[%s3784_s17 + $0x28] sm:$0xff]  ;;  %v1332_v33 = vld [vmem:[%s3784_s17 + $0x30] sm:$0xff]  ;;  %v1333_v34 = vld [vmem:[%s3784_s17 + $0x38] sm:$0xff] }
 0x227   : > { %v1334_v35 = vld [vmem:[%s3784_s17 + $0x40] sm:$0xff] }
 0x228   : > { %v871_v38 = vadd.f32 %v2787_v37, %v3758_v61  ;;  %v912_v39 = vmax.f32 %v868_v36, 0.0  ;;  %v1335_v36 = vld [vmem:[%s3784_s17 + $0x48] sm:$0xff]  ;;  %v1336_v37 = vld [vmem:[%s3784_s17 + $0x50] sm:$0xff] }
 0x229   : > { %1360 = vrot.lane.b32.xlu0 %v1327_v30, %s3385_s23 }
 0x22a   : > { %v913_v40 = vmax.f32 %v871_v38, 0.0  ;;  %v2788_v41 = vpop.f32.mrb[16].mxu1  ;;  %v1337_v38 = vld [vmem:[%s3784_s17 + $0x58] sm:$0xff] }
 0x22b   : > { %v2789_v42 = vpop.f32.mrb[17].mxu1 }
 0x22c   : > { %v2790_v43 = vadd.f32 %v2789_v42, %v2788_v41  ;;  %v2791_v44 = vpop.f32.mrb[18].mxu1  ;;  %v925_v45 = vpack.c.bf16 %v913_v40, %v912_v39  ;;  %v1338_v39 = vld [vmem:[%s3784_s17 + $0x60] sm:$0xff]  ;;  %v1339_v40 = vld [vmem:[%s3784_s17 + $0x68] sm:$0xff]  ;;  %v1340_v41 = vld [vmem:[%s3784_s17 + $0x70] sm:$0xff] }
 0x22d   : > { %v2792_v46 = vpop.f32.mrb[19].mxu1  ;;  %1366 = vrot.lane.b32.xlu0 %v1330_v31, %s3385_s23  ;;  %v1341_v42 = vld [vmem:[%s3784_s17 + $0x78] sm:$0xff] }
 0x22e   : > { %v876_v47 = vadd.f32 %v2790_v43, %v3758_v61  ;;  %v2793_v48 = vadd.f32 %v2792_v46, %v2791_v44  ;;  %2954 = vmatmul.mubr.bf16.gmra.mrb[36].mxu0 %v925_v45  ;;  %v946_v43 = vld [vmem:[%s4341_s10 + $0x2] ss:$0 sm:$0xff] }
 0x230   : > { %v879_v55 = vadd.f32 %v2793_v48, %v3758_v61  ;;  %v914_v56 = vmax.f32 %v876_v47, 0.0 }
 0x231   : > { %1370 = vrot.lane.b32.xlu0 %v1332_v33, %s3385_s23 }
 0x232   : > { %v915_v49 = vmax.f32 %v879_v55, 0.0  ;;  %v2794_v50 = vpop.f32.mrb[20].mxu1 }
 0x233   : > { %v2795_v53 = vpop.f32.mrb[21].mxu1 }
 0x234   : > { %v2796_v57 = vadd.f32 %v2795_v53, %v2794_v50  ;;  %v2797_v58 = vpop.f32.mrb[22].mxu1  ;;  %v926_v59 = vpack.c.bf16 %v915_v49, %v914_v56 }
 0x235   : > { %v2798_v60 = vpop.f32.mrb[23].mxu1  ;;  %1374 = vrot.lane.b32.xlu0 %v1334_v35, %s3385_s23 }
 0x236   : > { %v884_v62 = vadd.f32 %v2796_v57, %v3758_v61  ;;  %v2799_v63 = vadd.f32 %v2798_v60, %v2797_v58  ;;  %2957 = vmatprep.mubr.bf16.mxu0 %v926_v59 }
 0x238   : > { %v887_v1 = vadd.f32 %v2799_v63, %v3758_v61  ;;  %v916_v2 = vmax.f32 %v884_v62, 0.0 }
 0x239   : > { %1378 = vrot.lane.b32.xlu0 %v1336_v37, %s3385_s23 }
 0x23a   : > { %v917_v3 = vmax.f32 %v887_v1, 0.0  ;;  %v2800_v4 = vpop.f32.mrb[24].mxu1 }
 0x23b   : > { %v2801_v5 = vpop.f32.mrb[25].mxu1 }
 0x23c   : > { %v2802_v6 = vadd.f32 %v2801_v5, %v2800_v4  ;;  %v2803_v7 = vpop.f32.mrb[26].mxu1  ;;  %v927_v8 = vpack.c.bf16 %v917_v3, %v916_v2 }
 0x23d   : > { %v2804_v9 = vpop.f32.mrb[27].mxu1  ;;  %1382 = vrot.lane.b32.xlu0 %v1338_v39, %s3385_s23 }
 0x23e   : > { %v892_v10 = vadd.f32 %v2802_v6, %v3758_v61  ;;  %v2805_v11 = vadd.f32 %v2804_v9, %v2803_v7  ;;  %2958 = vmatmul.mubr.bf16.gmra.mrb[40].mxu0 %v927_v8 }
 0x240   : > { %v895_v12 = vadd.f32 %v2805_v11, %v3758_v61  ;;  %v918_v13 = vmax.f32 %v892_v10, 0.0 }
 0x241   : > { %1386 = vrot.lane.b32.xlu0 %v1340_v41, %s3385_s23  ;;  %v3811_v41 = vld [vmem:[%s4341_s10 + $0x3] ss:$0 sm:$0xff] }
 0x242   : > { %v919_v14 = vmax.f32 %v895_v12, 0.0  ;;  %v2806_v15 = vpop.f32.mrb[28].mxu1 }
 0x243   : > { %v2807_v16 = vpop.f32.mrb[29].mxu1 }
 0x244   : > { %v2808_v17 = vadd.f32 %v2807_v16, %v2806_v15  ;;  %v2809_v18 = vpop.f32.mrb[30].mxu1  ;;  %v928_v19 = vpack.c.bf16 %v919_v14, %v918_v13 }
 0x245   : > { %v2810_v20 = vpop.f32.mrb[31].mxu1 }
 0x246   : > { %v900_v21 = vadd.f32 %v2808_v17, %v3758_v61  ;;  %v2811_v22 = vadd.f32 %v2810_v20, %v2809_v18  ;;  %2961 = vmatprep.mubr.bf16.mxu0 %v928_v19 }
 0x248   : > { %v903_v23 = vadd.f32 %v2811_v22, %v3758_v61  ;;  %v920_v24 = vmax.f32 %v900_v21, 0.0  ;;  %v1328_v61 = vld [vmem:[%s3784_s17 + $0x10] sm:$0xff]  ;;  %s3389_s17 = smov [#allocation7]  }
 0x249   : > { %1362 = vrot.lane.b32.xlu1 %v1328_v61, %s3385_s23 }
 0x24a   : > { %v921_v25 = vmax.f32 %v903_v23, 0.0 }
 0x24c   : > { %v929_v26 = vpack.c.bf16 %v921_v25, %v920_v24 }
 0x24d   : > { %1364 = vrot.lane.b32.xlu1 %v1329_v29, %s3385_s23 }
 0x24e   : > { %2962 = vmatmul.mubr.bf16.gmra.mrb[44].mxu0 %v929_v26 }
 0x251   : > { %1368 = vrot.lane.b32.xlu1 %v1331_v32, %s3385_s23 }
 0x255   : > { %1372 = vrot.lane.b32.xlu1 %v1333_v34, %s3385_s23 }
 0x259   : > { %1376 = vrot.lane.b32.xlu1 %v1335_v36, %s3385_s23 }
 0x25d   : > { %1380 = vrot.lane.b32.xlu1 %v1337_v38, %s3385_s23 }
 0x261   : > { %1384 = vrot.lane.b32.xlu1 %v1339_v40, %s3385_s23  ;;  %v3169_v40 = vld [vmem:[#allocation5] sm:$0xff]  }
 0x262   : > { %2997 = vmatprep.subr.bf16.mxu0 %v3169_v40 }
 0x263   : > { %2998 = vmatpush3.bf16.msra.mxu0 %v3169_v40 }
 0x265   : > { %1388 = vrot.lane.b32.xlu1 %v1341_v42, %s3385_s23  ;;  %s3310_s23 = sshll.u32 %s3389_s17, 4  ;;  %s3311_s23 = int_to_ptr.vmem [resolvable:$false] %s3310_s23 }
 0x266   : > { %s3312_s13 = scalar_lea.vmem %s3311_s23, 4096  ;;  %p3313_p4 = scmp.lt.s32.totalorder %s4282_s30, %s3311_s23 }
 0x2f1   : > { %v2951_v44 = vpop.f32.mrb[32].mxu0 }
 0x2f2   : > { %v1038_v45 = vadd.f32 %v2951_v44, %v946_v43  ;;  %v1029_v46 = vpop.f32.mrb[33].mxu0 }
 0x2f3   : > { %v1030_v47 = vadd.f32 %v1029_v46, %v946_v43  ;;  %v2952_v48 = vpop.f32.mrb[34].mxu0 }
 0x2f4   : > { %v1041_v55 = vadd.f32 %v2952_v48, %v946_v43  ;;  %v1032_v56 = vpop.f32.mrb[35].mxu0  ;;  %v1094_v50 = vmax.f32 %v1038_v45, 0.0 }
 0x2f5   : > { %v1033_v49 = vadd.f32 %v1032_v56, %v946_v43  ;;  %v1092_v57 = vmax.f32 %v1030_v47, 0.0 }
 0x2f6   : > { %v1095_v53 = vmax.f32 %v1041_v55, 0.0 }
 0x2f7   : > { %v1093_v58 = vmax.f32 %v1033_v49, 0.0 }
 0x2f8   : > { %v1109_v59 = vpack.c.bf16 %v1095_v53, %v1094_v50 }
 0x2f9   : > { %v1108_v60 = vpack.c.bf16 %v1093_v58, %v1092_v57 }
 0x2fb   : > { %2981 = vmatprep.mubr.bf16.mxu1 %v1108_v60 }
 0x2fc   : > { %2982 = vmatmul.mubr.bf16.vlgmr.msra.gmra.mrb[32].mxu1 %v1109_v59 }
 0x301   : > { %v2955_v62 = vpop.f32.mrb[36].mxu0 }
 0x302   : > { %v1054_v63 = vadd.f32 %v2955_v62, %v946_v43  ;;  %v1045_v1 = vpop.f32.mrb[37].mxu0  ;;  %v1359_v62 = vpop.permute.xlu0 %1358 }
 0x303   : > { %v1046_v2 = vadd.f32 %v1045_v1, %v946_v43  ;;  %v2956_v3 = vpop.f32.mrb[38].mxu0 }
 0x304   : > { %v1057_v4 = vadd.f32 %v2956_v3, %v946_v43  ;;  %v1048_v5 = vpop.f32.mrb[39].mxu0  ;;  %v1098_v7 = vmax.f32 %v1054_v63, 0.0  ;;  %v1363_v63 = vpop.permute.xlu1 %1362 }
 0x305   : > { %v1049_v6 = vadd.f32 %v1048_v5, %v946_v43  ;;  %v1096_v9 = vmax.f32 %v1046_v2, 0.0 }
 0x306   : > { %v1099_v8 = vmax.f32 %v1057_v4, 0.0 }
 0x307   : > { %v1097_v10 = vmax.f32 %v1049_v6, 0.0 }
 0x308   : > { %v1111_v11 = vpack.c.bf16 %v1099_v8, %v1098_v7  ;;  %v1361_v7 = vpop.permute.xlu0 %1360 }
 0x309   : > { %v1110_v12 = vpack.c.bf16 %v1097_v10, %v1096_v9 }
 0x30b   : > { %2985 = vmatprep.mubr.bf16.mxu1 %v1110_v12 }
 0x30c   : > { %2986 = vmatmul.mubr.bf16.gmra.mrb[36].mxu1 %v1111_v11 }
 0x311   : > { %v2959_v13 = vpop.f32.mrb[40].mxu0 }
 0x312   : > { %v1070_v14 = vadd.f32 %v2959_v13, %v946_v43  ;;  %v1061_v15 = vpop.f32.mrb[41].mxu0 }
 0x313   : > { %v1062_v16 = vadd.f32 %v1061_v15, %v946_v43  ;;  %v2960_v17 = vpop.f32.mrb[42].mxu0 }
 0x314   : > { %v1073_v18 = vadd.f32 %v2960_v17, %v946_v43  ;;  %v1064_v19 = vpop.f32.mrb[43].mxu0  ;;  %v1102_v21 = vmax.f32 %v1070_v14, 0.0 }
 0x315   : > { %v1065_v20 = vadd.f32 %v1064_v19, %v946_v43  ;;  %v1100_v23 = vmax.f32 %v1062_v16, 0.0 }
 0x316   : > { %v1103_v22 = vmax.f32 %v1073_v18, 0.0 }
 0x317   : > { %v1101_v24 = vmax.f32 %v1065_v20, 0.0 }
 0x318   : > { %v1113_v25 = vpack.c.bf16 %v1103_v22, %v1102_v21  ;;  %v1365_v21 = vpop.permute.xlu1 %1364 }
 0x319   : > { %v1112_v26 = vpack.c.bf16 %v1101_v24, %v1100_v23 }
 0x31b   : > { %2989 = vmatprep.mubr.bf16.mxu1 %v1112_v26 }
 0x31c   : > { %2990 = vmatmul.mubr.bf16.gmra.mrb[40].mxu1 %v1113_v25 }
 0x321   : > { %v2963_v27 = vpop.f32.mrb[44].mxu0 }
 0x322   : > { %v1086_v61 = vadd.f32 %v2963_v27, %v946_v43  ;;  %v1077_v28 = vpop.f32.mrb[45].mxu0  ;;  %v1367_v27 = vpop.permute.xlu0 %1366 }
 0x323   : > { %v1078_v29 = vadd.f32 %v1077_v28, %v946_v43  ;;  %v2964_v30 = vpop.f32.mrb[46].mxu0 }
 0x324   : > { %v1089_v31 = vadd.f32 %v2964_v30, %v946_v43  ;;  %v1080_v32 = vpop.f32.mrb[47].mxu0  ;;  %v1106_v34 = vmax.f32 %v1086_v61, 0.0  ;;  %v1369_v61 = vpop.permute.xlu1 %1368 }
 0x325   : > { %v1081_v33 = vadd.f32 %v1080_v32, %v946_v43  ;;  %v1104_v36 = vmax.f32 %v1078_v29, 0.0 }
 0x326   : > { %v1107_v35 = vmax.f32 %v1089_v31, 0.0  ;;  %v1371_v40 = vpop.permute.xlu0 %1370 }
 0x327   : > { %v1105_v37 = vmax.f32 %v1081_v33, 0.0 }
 0x328   : > { %v1115_v38 = vpack.c.bf16 %v1107_v35, %v1106_v34 }
 0x329   : > { %v1114_v39 = vpack.c.bf16 %v1105_v37, %v1104_v36 }
 0x32b   : > { %2993 = vmatprep.mubr.bf16.mxu1 %v1114_v39 }
 0x32c   : > { %2994 = vmatmul.mubr.bf16.gmra.mrb[44].mxu1 %v1115_v38 }
 0x3cf   : > { %v2983_v42 = vpop.f32.mrb[32].mxu1 }
 0x3d0   : > { %v3814_v43 = vadd.f32 %v2983_v42, %v3811_v41  ;;  %v1215_v44 = vpop.f32.mrb[33].mxu1 }
 0x3d1   : > { %v3817_v45 = vadd.f32 %v1215_v44, %v3811_v41  ;;  %v2984_v46 = vpop.f32.mrb[34].mxu1 }
 0x3d2   : > { %v1280_v47 = vmul.f32 0.5, %v3814_v43  ;;  %2350 = vst.msk [vmem:[%s3820_s26 + $0x10] sm:$0xff] %vm2347_vm2, %v3814_v43  ;;  %v3826_v48 = vadd.f32 %v2984_v46, %v3811_v41  ;;  %v1218_v55 = vpop.f32.mrb[35].mxu1 }
 0x3d3   : > { %v1278_v56 = vmul.f32 0.5, %v3817_v45  ;;  %2348 = vst.msk [vmem:[%s3820_s26] sm:$0xff] %vm2347_vm2, %v3817_v45  ;;  %v3833_v49 = vadd.f32 %v1218_v55, %v3811_v41 }
 0x3d4   : > { %v1298_v50 = vmul.f32 1.442695, %v1280_v47  ;;  %v1281_v53 = vmul.f32 0.5, %v3826_v48  ;;  %2351 = vst.msk [vmem:[%s3820_s26 + $0x18] sm:$0xff] %vm2347_vm2, %v3826_v48 }
 0x3d5   : > { %v1294_v57 = vmul.f32 1.442695, %v1278_v56  ;;  %v1279_v58 = vmul.f32 0.5, %v3833_v49  ;;  %2349 = vst.msk [vmem:[%s3820_s26 + $0x8] sm:$0xff] %vm2347_vm2, %v3833_v49 }
 0x3d6   : > { %v1300_v59 = vmul.f32 1.442695, %v1281_v53  ;;  %v1373_v53 = vpop.permute.xlu1 %1372 }
 0x3d7   : > { %3218 = vpow2.f32 %v1294_v57  ;;  %v1296_v60 = vmul.f32 1.442695, %v1279_v58 }
 0x3d8   : > { %3220 = vpow2.f32 %v1298_v50 }
 0x3d9   : > { %3222 = vpow2.f32 %v1296_v60 }
 0x3da   : > { %3224 = vpow2.f32 %v1300_v59 }
 0x3df   : > { %v2987_v1 = vpop.f32.mrb[36].mxu1 }
 0x3e0   : > { %v3844_v2 = vadd.f32 %v2987_v1, %v3811_v41  ;;  %v1231_v3 = vpop.f32.mrb[37].mxu1  ;;  %v1377_v1 = vpop.permute.xlu1 %1376 }
 0x3e1   : > { %v3219_v4 = vpop.eup %3218  ;;  %v3847_v5 = vadd.f32 %v1231_v3, %v3811_v41  ;;  %v2988_v6 = vpop.f32.mrb[38].mxu1 }
 0x3e2   : > { %v3221_v8 = vpop.eup %3220  ;;  %v1406_v9 = vmul.f32 %v3219_v4, %v1359_v62  ;;  %v1284_v10 = vmul.f32 0.5, %v3844_v2  ;;  %2354 = vst.msk [vmem:[%s3820_s26 + $0x30] sm:$0xff] %vm2347_vm2, %v3844_v2  ;;  %v3854_v11 = vadd.f32 %v2988_v6, %v3811_v41  ;;  %v1234_v12 = vpop.f32.mrb[39].mxu1 }
 0x3e3   : > { %v3223_v13 = vpop.eup %3222  ;;  %v1282_v14 = vmul.f32 0.5, %v3847_v5  ;;  %2352 = vst.msk [vmem:[%s3820_s26 + $0x20] sm:$0xff] %vm2347_vm2, %v3847_v5  ;;  %v3861_v15 = vadd.f32 %v1234_v12, %v3811_v41  ;;  %v1408_v23 = vmul.f32 %v3221_v8, %v1363_v63  ;;  %v1375_v63 = vpop.permute.xlu0 %1374 }
 0x3e4   : > { %v1306_v16 = vmul.f32 1.442695, %v1284_v10  ;;  %v1285_v17 = vmul.f32 0.5, %v3854_v11  ;;  %2355 = vst.msk [vmem:[%s3820_s26 + $0x38] sm:$0xff] %vm2347_vm2, %v3854_v11  ;;  %v1407_v18 = vmul.f32 %v3223_v13, %v1361_v7  ;;  %1438 = vrot.lane.b32.xlu0 %v1406_v9, %s3386_s24  ;;  %v3225_v19 = vpop.eup %3224 }
 0x3e5   : > { %v1302_v20 = vmul.f32 1.442695, %v1282_v14  ;;  %v1283_v22 = vmul.f32 0.5, %v3861_v15  ;;  %2353 = vst.msk [vmem:[%s3820_s26 + $0x28] sm:$0xff] %vm2347_vm2, %v3861_v15  ;;  %v1409_v26 = vmul.f32 %v3225_v19, %v1365_v21 }
 0x3e6   : > { %1440 = vrot.lane.b32.xlu1 %v1407_v18, %s3386_s24  ;;  %v1308_v24 = vmul.f32 1.442695, %v1285_v17 }
 0x3e7   : > { %3226 = vpow2.f32 %v1302_v20  ;;  %v1304_v25 = vmul.f32 1.442695, %v1283_v22  ;;  %v1379_v18 = vpop.permute.xlu0 %1378 }
 0x3e8   : > { %3228 = vpow2.f32 %v1306_v16  ;;  %1442 = vrot.lane.b32.xlu0 %v1408_v23, %s3386_s24 }
 0x3e9   : > { %3230 = vpow2.f32 %v1304_v25 }
 0x3ea   : > { %1444 = vrot.lane.b32.xlu1 %v1409_v26, %s3386_s24  ;;  %3232 = vpow2.f32 %v1308_v24  ;;  %v1381_v26 = vpop.permute.xlu1 %1380 }
 0x3ef   : > { %v2991_v28 = vpop.f32.mrb[40].mxu1 }
 0x3f0   : > { %v3876_v29 = vadd.f32 %v2991_v28, %v3811_v41  ;;  %v1247_v30 = vpop.f32.mrb[41].mxu1 }
 0x3f1   : > { %v3227_v31 = vpop.eup %3226  ;;  %v3879_v32 = vadd.f32 %v1247_v30, %v3811_v41  ;;  %v2992_v33 = vpop.f32.mrb[42].mxu1 }
 0x3f2   : > { %v3229_v34 = vpop.eup %3228  ;;  %v1410_v35 = vmul.f32 %v3227_v31, %v1367_v27  ;;  %v1288_v36 = vmul.f32 0.5, %v3876_v29  ;;  %2358 = vst.msk [vmem:[%s3820_s26 + $0x50] sm:$0xff] %vm2347_vm2, %v3876_v29  ;;  %v3886_v37 = vadd.f32 %v2992_v33, %v3811_v41  ;;  %v1250_v38 = vpop.f32.mrb[43].mxu1 }
 0x3f3   : > { %v3231_v39 = vpop.eup %3230  ;;  %v1286_v42 = vmul.f32 0.5, %v3879_v32  ;;  %2356 = vst.msk [vmem:[%s3820_s26 + $0x40] sm:$0xff] %vm2347_vm2, %v3879_v32  ;;  %v3893_v44 = vadd.f32 %v1250_v38, %v3811_v41  ;;  %v1412_v58 = vmul.f32 %v3229_v34, %v1371_v40  ;;  %v1383_v31 = vpop.permute.xlu0 %1382 }
 0x3f4   : > { %v1411_v46 = vmul.f32 %v3231_v39, %v1369_v61  ;;  %v1314_v47 = vmul.f32 1.442695, %v1288_v36  ;;  %v1289_v55 = vmul.f32 0.5, %v3886_v37  ;;  %2359 = vst.msk [vmem:[%s3820_s26 + $0x58] sm:$0xff] %vm2347_vm2, %v3886_v37  ;;  %1446 = vrot.lane.b32.xlu0 %v1410_v35, %s3386_s24  ;;  %v3233_v56 = vpop.eup %3232  ;;  %v1385_v33 = vpop.permute.xlu1 %1384 }
 0x3f5   : > { %v1310_v50 = vmul.f32 1.442695, %v1286_v42  ;;  %v1287_v57 = vmul.f32 0.5, %v3893_v44  ;;  %2357 = vst.msk [vmem:[%s3820_s26 + $0x48] sm:$0xff] %vm2347_vm2, %v3893_v44  ;;  %v1413_v62 = vmul.f32 %v3233_v56, %v1373_v53 }
 0x3f6   : > { %1448 = vrot.lane.b32.xlu1 %v1411_v46, %s3386_s24  ;;  %v1316_v59 = vmul.f32 1.442695, %v1289_v55 }
 0x3f7   : > { %3234 = vpow2.f32 %v1310_v50  ;;  %v1312_v60 = vmul.f32 1.442695, %v1287_v57  ;;  %v1387_v39 = vpop.permute.xlu0 %1386 }
 0x3f8   : > { %3236 = vpow2.f32 %v1314_v47  ;;  %1450 = vrot.lane.b32.xlu0 %v1412_v58, %s3386_s24  ;;  %v1389_v46 = vpop.permute.xlu1 %1388 }
 0x3f9   : > { %3238 = vpow2.f32 %v1312_v60 }
 0x3fa   : > { %1452 = vrot.lane.b32.xlu1 %v1413_v62, %s3386_s24  ;;  %3240 = vpow2.f32 %v1316_v59 }
 0x3ff   : > { %v2995_v3 = vpop.f32.mrb[44].mxu1 }
 0x400   : > { %v3908_v4 = vadd.f32 %v2995_v3, %v3811_v41  ;;  %v1263_v6 = vpop.f32.mrb[45].mxu1 }
 0x401   : > { %v3235_v7 = vpop.eup %3234  ;;  %v3911_v8 = vadd.f32 %v1263_v6, %v3811_v41  ;;  %v2996_v9 = vpop.f32.mrb[46].mxu1 }
 0x402   : > { %v3237_v10 = vpop.eup %3236  ;;  %v1414_v12 = vmul.f32 %v3235_v7, %v1375_v63  ;;  %v1292_v13 = vmul.f32 0.5, %v3908_v4  ;;  %2362 = vst.msk [vmem:[%s3820_s26 + $0x70] sm:$0xff] %vm2347_vm2, %v3908_v4  ;;  %v3918_v14 = vadd.f32 %v2996_v9, %v3811_v41  ;;  %v1266_v16 = vpop.f32.mrb[47].mxu1 }
 0x403   : > { %v3239_v17 = vpop.eup %3238  ;;  %v1290_v19 = vmul.f32 0.5, %v3911_v8  ;;  %2360 = vst.msk [vmem:[%s3820_s26 + $0x60] sm:$0xff] %vm2347_vm2, %v3911_v8  ;;  %v3925_v20 = vadd.f32 %v1266_v16, %v3811_v41  ;;  %v1416_v61 = vmul.f32 %v3237_v10, %v1379_v18 }
 0x404   : > { %v1415_v21 = vmul.f32 %v3239_v17, %v1377_v1  ;;  %v1322_v22 = vmul.f32 1.442695, %v1292_v13  ;;  %v1293_v23 = vmul.f32 0.5, %v3918_v14  ;;  %2363 = vst.msk [vmem:[%s3820_s26 + $0x78] sm:$0xff] %vm2347_vm2, %v3918_v14  ;;  %1454 = vrot.lane.b32.xlu0 %v1414_v12, %s3386_s24  ;;  %v3241_v24 = vpop.eup %3240 }
 0x405   : > { %v1318_v25 = vmul.f32 1.442695, %v1290_v19  ;;  %v1291_v27 = vmul.f32 0.5, %v3925_v20  ;;  %2361 = vst.msk [vmem:[%s3820_s26 + $0x68] sm:$0xff] %vm2347_vm2, %v3925_v20  ;;  %v1417_v30 = vmul.f32 %v3241_v24, %v1381_v26 }
 0x406   : > { %1456 = vrot.lane.b32.xlu1 %v1415_v21, %s3386_s24  ;;  %v1324_v41 = vmul.f32 1.442695, %v1293_v23 }
 0x407   : > { %3242 = vpow2.f32 %v1318_v25  ;;  %v1320_v28 = vmul.f32 1.442695, %v1291_v27  ;;  %v3172_v27 = vld [vmem:[%s4338_s7 + $0x10] sm:$0xff]  }
 0x408   : > { %3244 = vpow2.f32 %v1322_v22  ;;  %1458 = vrot.lane.b32.xlu0 %v1416_v61, %s3386_s24 }
 0x409   : > { %3246 = vpow2.f32 %v1320_v28  ;;  %v3176_v28 = vld [vmem:[%s4338_s7 + $0x30] sm:$0xff]  }
 0x40a   : > { %1460 = vrot.lane.b32.xlu1 %v1417_v30, %s3386_s24  ;;  %3248 = vpow2.f32 %v1324_v41  ;;  %v3177_v30 = vld [vmem:[%s4338_s7 + $0x38] sm:$0xff]  }
 0x411   : > { %v3243_v34 = vpop.eup %3242 }
 0x412   : > { %v3245_v35 = vpop.eup %3244  ;;  %v1418_v36 = vmul.f32 %v3243_v34, %v1383_v31 }
 0x413   : > { %v3247_v38 = vpop.eup %3246  ;;  %v1420_v47 = vmul.f32 %v3245_v35, %v1387_v39 }
 0x414   : > { %v1419_v40 = vmul.f32 %v3247_v38, %v1385_v33  ;;  %1462 = vrot.lane.b32.xlu0 %v1418_v36, %s3386_s24  ;;  %v3249_v42 = vpop.eup %3248 }
 0x415   : > { %v1421_v55 = vmul.f32 %v3249_v42, %v1389_v46  ;;  %v3178_v46 = vld [vmem:[%s4339_s8] ss:$8 sps:$4 sm:$0xff]  }
 0x416   : > { %1464 = vrot.lane.b32.xlu1 %v1419_v40, %s3386_s24 }
 0x418   : > { %1466 = vrot.lane.b32.xlu0 %v1420_v47, %s3386_s24  ;;  %v3180_v47 = vld [vmem:[%s4339_s8 + $0x4] ss:$8 sps:$4 sm:$0xff]  }
 0x419   : > { %1960 = vmatprep.subr.bf16.mxu0 %v3180_v47 }
 0x41a   : > { %1468 = vrot.lane.b32.xlu1 %v1421_v55, %s3386_s24  ;;  %v3183_v55 = vld [vmem:[%s4339_s8 + $0x14] ss:$8 sps:$4 sm:$0xff]   ;;  %s2747_s24 = sshll.u32 %s3473_s21, 11  ;;  %s3306_s21 = scalar_lea.vmem %s4282_s30, 2048 }
 0x41b   : > { %s4280_s19 = scalar_lea.hbm %s4342_s11, %s2747_s24  ;;  %p3307_p10 = scmp.ne.s32.totalorder %s4282_s30, %s3306_s21 }
 0x41c   : > { %p3314_p7 = scmp.lt.s32.totalorder %s3312_s13, %s3306_s21 }
 0x41d   : > { %p3308_p2 = pnand %p3307_p10, %p4365_p1 }
 0x41e   : > { %p3315_p8 = por %p3314_p7, %p3313_p4 }
 0x41f   : > { %p3309_p3 = pneg %p3308_p2 }
 0x421   : > { %p3316_p11 = pnand %p3315_p8, %p3309_p3 }
 0x456   : > { %v1439_v56 = vpop.permute.xlu0 %1438 }
 0x457   : > { %v1486_v53 = vadd.f32 %v1439_v56, %v3817_v45 }
 0x458   : > { %v1441_v50 = vpop.permute.xlu1 %1440 }
 0x459   : > { %v1487_v57 = vadd.f32 %v1441_v50, %v3833_v49  ;;  %v3181_v50 = vld [vmem:[%s4339_s8 + $0x10] ss:$8 sps:$4 sm:$0xff]  }
 0x45a   : > { %v1443_v58 = vpop.permute.xlu0 %1442 }
 0x45b   : > { %v1502_v59 = vpack.c.bf16 %v1487_v57, %v1486_v53  ;;  %v1488_v60 = vadd.f32 %v1443_v58, %v3814_v43 }
 0x45c   : > { %v1445_v62 = vpop.permute.xlu1 %1444 }
 0x45d   : > { %v1489_v63 = vadd.f32 %v1445_v62, %v3826_v48  ;;  %2999 = vmatprep.mubr.msk.bf16.mxu0 %vm1519_vm3, %v1502_v59  ;;  %2384 = vrot.lane.b32.xlu0 %v1488_v60, %s3387_s25  ;;  %v3184_v59 = vld [vmem:[%s4339_s8 + $0x20] ss:$8 sps:$4 sm:$0xff]   ;;  %v3187_v62 = vld [vmem:[%s4339_s8 + $0x30] ss:$8 sps:$4 sm:$0xff]  }
 0x45f   : > { %v1503_v1 = vpack.c.bf16 %v1489_v63, %v1488_v60  ;;  %2386 = vrot.lane.b32.xlu1 %v1489_v63, %s3387_s25  ;;  %v3189_v60 = vld [vmem:[%s4339_s8 + $0x34] ss:$8 sps:$4 sm:$0xff]   ;;  %v3192_v63 = vld [vmem:[%s4339_s8 + $0x44] ss:$8 sps:$4 sm:$0xff]  }
 0x461   : > { %2380 = vrot.lane.b32.xlu0 %v1486_v53, %s3387_s25  ;;  %3000 = vmatmul.mubr.msk.bf16.vlgmr.msra.gmra.mrb[48].mxu0 %vm1519_vm3, %v1503_v1  ;;  %v3190_v1 = vld [vmem:[%s4339_s8 + $0x40] ss:$8 sps:$4 sm:$0xff]  }
 0x462   : > { %1961 = vmatpush1.bf16.msra.mxu0 %v3178_v46 }
 0x463   : > { %2382 = vrot.lane.b32.xlu1 %v1487_v57, %s3387_s25  ;;  %1962 = vmatprep.subr.bf16.mxu0 %v3183_v55  ;;  %v3186_v57 = vld [vmem:[%s4339_s8 + $0x24] ss:$8 sps:$4 sm:$0xff]  }
 0x466   : > { %v1447_v45 = vpop.permute.xlu0 %1446  ;;  %1963 = vmatpush1.bf16.msra.mxu0 %v3181_v50 }
 0x467   : > { %v1490_v43 = vadd.f32 %v1447_v45, %v3847_v5  ;;  %1964 = vmatprep.subr.bf16.mxu0 %v3186_v57 }
 0x468   : > { %v1449_v49 = vpop.permute.xlu1 %1448 }
 0x469   : > { %v1491_v48 = vadd.f32 %v1449_v49, %v3861_v15  ;;  %v3195_v49 = vld [vmem:[%s4339_s8 + $0x54] ss:$8 sps:$4 sm:$0xff]  }
 0x46a   : > { %v1451_v3 = vpop.permute.xlu0 %1450  ;;  %1965 = vmatpush1.bf16.msra.mxu0 %v3184_v59 }
 0x46b   : > { %v1504_v6 = vpack.c.bf16 %v1491_v48, %v1490_v43  ;;  %v1492_v7 = vadd.f32 %v1451_v3, %v3844_v2  ;;  %1966 = vmatprep.subr.bf16.mxu0 %v3189_v60 }
 0x46c   : > { %v1453_v9 = vpop.permute.xlu1 %1452 }
 0x46d   : > { %v1493_v10 = vadd.f32 %v1453_v9, %v3854_v11  ;;  %3003 = vmatprep.mubr.msk.bf16.mxu0 %vm1519_vm3, %v1504_v6  ;;  %2392 = vrot.lane.b32.xlu0 %v1492_v7, %s3387_s25 }
 0x46e   : > { %1967 = vmatpush1.bf16.msra.mxu0 %v3187_v62 }
 0x46f   : > { %v1505_v12 = vpack.c.bf16 %v1493_v10, %v1492_v7  ;;  %2394 = vrot.lane.b32.xlu1 %v1493_v10, %s3387_s25  ;;  %1968 = vmatprep.subr.bf16.mxu0 %v3192_v63  ;;  %v1512_v7 = vld [vmem:[%s4341_s10 + $0x4] ss:$0 sm:$0xff] }
 0x471   : > { %2388 = vrot.lane.b32.xlu0 %v1490_v43, %s3387_s25  ;;  %3004 = vmatmul.mubr.msk.bf16.gmra.mrb[52].mxu0 %vm1519_vm3, %v1505_v12 }
 0x472   : > { %1969 = vmatpush1.bf16.msra.mxu0 %v3190_v1 }
 0x473   : > { %2390 = vrot.lane.b32.xlu1 %v1491_v48, %s3387_s25  ;;  %v3193_v48 = vld [vmem:[%s4339_s8 + $0x50] ss:$8 sps:$4 sm:$0xff]   ;;  %1970 = vmatprep.subr.bf16.mxu0 %v3195_v49 }
 0x476   : > { %v1455_v5 = vpop.permute.xlu0 %1454  ;;  %1971 = vmatpush1.bf16.msra.mxu0 %v3193_v48  ;;  %v3198_v48 = vld [vmem:[%s4339_s8 + $0x64] ss:$8 sps:$4 sm:$0xff]  }
 0x477   : > { %v1494_v2 = vadd.f32 %v1455_v5, %v3879_v32  ;;  %1972 = vmatprep.subr.bf16.mxu0 %v3198_v48 }
 0x478   : > { %v1457_v15 = vpop.permute.xlu1 %1456 }
 0x479   : > { %v1495_v13 = vadd.f32 %v1457_v15, %v3893_v44 }
 0x47a   : > { %v1459_v11 = vpop.permute.xlu0 %1458 }
 0x47b   : > { %v1506_v16 = vpack.c.bf16 %v1495_v13, %v1494_v2  ;;  %v1496_v17 = vadd.f32 %v1459_v11, %v3876_v29  ;;  %v3170_v29 = vld [vmem:[%s4338_s7] sm:$0xff]  }
 0x47c   : > { %v1461_v18 = vpop.permute.xlu1 %1460  ;;  %3015 = vmatprep.subr.bf16.mxu1 %v3170_v29 }
 0x47d   : > { %v1497_v19 = vadd.f32 %v1461_v18, %v3886_v37  ;;  %3007 = vmatprep.mubr.msk.bf16.mxu0 %vm1519_vm3, %v1506_v16  ;;  %2400 = vrot.lane.b32.xlu0 %v1496_v17, %s3387_s25  ;;  %v3171_v37 = vld [vmem:[%s4338_s7 + $0x8] sm:$0xff]  }
 0x47e   : > { %3016 = vmatpush3.bf16.msra.mxu1 %v3170_v29 }
 0x47f   : > { %v1507_v21 = vpack.c.bf16 %v1497_v19, %v1496_v17  ;;  %2402 = vrot.lane.b32.xlu1 %v1497_v19, %s3387_s25  ;;  %3017 = vmatprep.subr.bf16.mxu1 %v3171_v37 }
 0x481   : > { %2396 = vrot.lane.b32.xlu0 %v1494_v2, %s3387_s25  ;;  %3008 = vmatmul.mubr.msk.bf16.gmra.mrb[56].mxu0 %vm1519_vm3, %v1507_v21 }
 0x482   : > { %3018 = vmatpush3.bf16.msra.mxu1 %v3171_v37 }
 0x483   : > { %2398 = vrot.lane.b32.xlu1 %v1495_v13, %s3387_s25  ;;  %3019 = vmatprep.subr.bf16.mxu1 %v3172_v27 }
 0x486   : > { %v1463_v32 = vpop.permute.xlu0 %1462  ;;  %3020 = vmatpush3.bf16.msra.mxu1 %v3172_v27 }
 0x487   : > { %v1498_v22 = vadd.f32 %v1463_v32, %v3911_v8 }
 0x488   : > { %v1465_v44 = vpop.permute.xlu1 %1464 }
 0x489   : > { %v1499_v23 = vadd.f32 %v1465_v44, %v3925_v20  ;;  %v3175_v20 = vld [vmem:[%s4338_s7 + $0x28] sm:$0xff]  }
 0x48a   : > { %v1467_v24 = vpop.permute.xlu0 %1466 }
 0x48b   : > { %v1508_v25 = vpack.c.bf16 %v1499_v23, %v1498_v22  ;;  %v1500_v26 = vadd.f32 %v1467_v24, %v3908_v4  ;;  %v3173_v4 = vld [vmem:[%s4338_s7 + $0x18] sm:$0xff]  }
 0x48c   : > { %v1469_v61 = vpop.permute.xlu1 %1468  ;;  %3021 = vmatprep.subr.bf16.mxu1 %v3173_v4 }
 0x48d   : > { %v1501_v41 = vadd.f32 %v1469_v61, %v3918_v14  ;;  %3011 = vmatprep.mubr.msk.bf16.mxu0 %vm1519_vm3, %v1508_v25  ;;  %2408 = vrot.lane.b32.xlu0 %v1500_v26, %s3387_s25  ;;  %v3174_v14 = vld [vmem:[%s4338_s7 + $0x20] sm:$0xff]  }
 0x48e   : > { %3022 = vmatpush3.bf16.msra.mxu1 %v3173_v4 }
 0x48f   : > { %v1509_v8 = vpack.c.bf16 %v1501_v41, %v1500_v26  ;;  %2410 = vrot.lane.b32.xlu1 %v1501_v41, %s3387_s25  ;;  %3023 = vmatprep.subr.bf16.mxu1 %v3174_v14 }
 0x491   : > { %2404 = vrot.lane.b32.xlu0 %v1498_v22, %s3387_s25  ;;  %3012 = vmatmul.mubr.msk.bf16.gmra.mrb[60].mxu0 %vm1519_vm3, %v1509_v8 }
 0x492   : > { %1992 = vmatprep.mubr.bf16.mxu0 %v3384_v0  ;;  %3024 = vmatpush3.bf16.msra.mxu1 %v3174_v14 }
 0x493   : > { %2406 = vrot.lane.b32.xlu1 %v1499_v23, %s3387_s25  ;;  %3025 = vmatprep.subr.bf16.mxu1 %v3175_v20 }
 0x496   : > { %3026 = vmatpush3.bf16.msra.mxu1 %v3175_v20 }
 0x497   : > { %3027 = vmatprep.subr.bf16.mxu1 %v3176_v28 }
 0x49a   : > { %3028 = vmatpush3.bf16.msra.mxu1 %v3176_v28 }
 0x49b   : > { %3029 = vmatprep.subr.bf16.mxu1 %v3177_v30 }
 0x49e   : > { %3030 = vmatpush3.bf16.msra.mxu1 %v3177_v30 }
 0x4cf   : > { %v2385_v31 = vpop.permute.xlu0 %2384 }
 0x4d0   : > { %2431 = vst.msk [vmem:[%s3820_s26 + $0x10] sm:$0xff] %vm2428_vm4, %v2385_v31 }
 0x4d1   : > { %v2387_v33 = vpop.permute.xlu1 %2386 }
 0x4d2   : > { %2432 = vst.msk [vmem:[%s3820_s26 + $0x18] sm:$0xff] %vm2428_vm4, %v2387_v33 }
 0x4d3   : > { %v2381_v34 = vpop.permute.xlu0 %2380 }
 0x4d4   : > { %2429 = vst.msk [vmem:[%s3820_s26] sm:$0xff] %vm2428_vm4, %v2381_v34 }
 0x4d5   : > { %v2383_v35 = vpop.permute.xlu1 %2382 }
 0x4d6   : > { %2430 = vst.msk [vmem:[%s3820_s26 + $0x8] sm:$0xff] %vm2428_vm4, %v2383_v35 }
 0x4df   : > { %v2393_v36 = vpop.permute.xlu0 %2392 }
 0x4e0   : > { %2435 = vst.msk [vmem:[%s3820_s26 + $0x30] sm:$0xff] %vm2428_vm4, %v2393_v36 }
 0x4e1   : > { %v2395_v38 = vpop.permute.xlu1 %2394 }
 0x4e2   : > { %2436 = vst.msk [vmem:[%s3820_s26 + $0x38] sm:$0xff] %vm2428_vm4, %v2395_v38 }
 0x4e3   : > { %v2389_v39 = vpop.permute.xlu0 %2388 }
 0x4e4   : > { %2433 = vst.msk [vmem:[%s3820_s26 + $0x20] sm:$0xff] %vm2428_vm4, %v2389_v39 }
 0x4e5   : > { %v2391_v40 = vpop.permute.xlu1 %2390 }
 0x4e6   : > { %2434 = vst.msk [vmem:[%s3820_s26 + $0x28] sm:$0xff] %vm2428_vm4, %v2391_v40 }
 0x4ef   : > { %v2401_v42 = vpop.permute.xlu0 %2400 }
 0x4f0   : > { %2439 = vst.msk [vmem:[%s3820_s26 + $0x50] sm:$0xff] %vm2428_vm4, %v2401_v42 }
 0x4f1   : > { %v2403_v56 = vpop.permute.xlu1 %2402 }
 0x4f2   : > { %2440 = vst.msk [vmem:[%s3820_s26 + $0x58] sm:$0xff] %vm2428_vm4, %v2403_v56 }
 0x4f3   : > { %v2397_v53 = vpop.permute.xlu0 %2396 }
 0x4f4   : > { %2437 = vst.msk [vmem:[%s3820_s26 + $0x40] sm:$0xff] %vm2428_vm4, %v2397_v53 }
 0x4f5   : > { %v2399_v58 = vpop.permute.xlu1 %2398 }
 0x4f6   : > { %2438 = vst.msk [vmem:[%s3820_s26 + $0x48] sm:$0xff] %vm2428_vm4, %v2399_v58 }
 0x4ff   : > { %v2409_v45 = vpop.permute.xlu0 %2408 }
 0x500   : > { %2443 = vst.msk [vmem:[%s3820_s26 + $0x70] sm:$0xff] %vm2428_vm4, %v2409_v45 }
 0x501   : > { %v2411_v43 = vpop.permute.xlu1 %2410 }
 0x502   : > { %2444 = vst.msk [vmem:[%s3820_s26 + $0x78] sm:$0xff] %vm2428_vm4, %v2411_v43 }
 0x503   : > { %v2405_v3 = vpop.permute.xlu0 %2404 }
 0x504   : > { %2441 = vst.msk [vmem:[%s3820_s26 + $0x60] sm:$0xff] %vm2428_vm4, %v2405_v3  ;;  %v3196_v3 = vld [vmem:[%s4339_s8 + $0x60] ss:$8 sps:$4 sm:$0xff]  }
 0x505   : > { %v2407_v6 = vpop.permute.xlu1 %2406  ;;  %1973 = vmatpush1.bf16.msra.mxu0 %v3196_v3 }
 0x506   : > { %2442 = vst.msk [vmem:[%s3820_s26 + $0x68] sm:$0xff] %vm2428_vm4, %v2407_v6  ;;  %v3201_v6 = vld [vmem:[%s4339_s8 + $0x74] ss:$8 sps:$4 sm:$0xff]  }
 0x507   : > { %1974 = vmatprep.subr.bf16.mxu0 %v3201_v6 }
 0x534   : > { %v3001_v9 = vpop.f32.mrb[48].mxu0 }
 0x535   : > { %v1587_v10 = vadd.f32 %v3001_v9, %v1512_v7  ;;  %v1578_v12 = vpop.f32.mrb[49].mxu0  ;;  %v3202_v9 = vld [vmem:[%s4340_s9 + $0x40] sm:$0xff]  }
 0x536   : > { %v1579_v5 = vadd.f32 %v1578_v12, %v1512_v7  ;;  %v3002_v15 = vpop.f32.mrb[50].mxu0  ;;  %v3204_v12 = vld [vmem:[%s4340_s9 + $0x48] sm:$0xff]   ;;  %3047 = vmatprep.subr.bf16.mxu1 %v3202_v9 }
 0x537   : > { %v1590_v2 = vadd.f32 %v3002_v15, %v1512_v7  ;;  %v1581_v13 = vpop.f32.mrb[51].mxu0  ;;  %v1643_v16 = vmax.f32 %v1587_v10, 0.0  ;;  %v3203_v10 = vld [vmem:[%s4340_s9] sm:$0xff]   ;;  %v3206_v15 = vld [vmem:[%s4340_s9 + $0x50] sm:$0xff]  }
 0x538   : > { %v1582_v11 = vadd.f32 %v1581_v13, %v1512_v7  ;;  %v1641_v18 = vmax.f32 %v1579_v5, 0.0  ;;  %v3205_v5 = vld [vmem:[%s4340_s9 + $0x8] sm:$0xff]   ;;  %v3208_v13 = vld [vmem:[%s4340_s9 + $0x58] sm:$0xff]  }
 0x539   : > { %v1644_v17 = vmax.f32 %v1590_v2, 0.0  ;;  %v3207_v2 = vld [vmem:[%s4340_s9 + $0x10] sm:$0xff]  }
 0x53a   : > { %v1642_v19 = vmax.f32 %v1582_v11, 0.0  ;;  %v3209_v11 = vld [vmem:[%s4340_s9 + $0x18] sm:$0xff]  }
 0x53b   : > { %v1658_v21 = vpack.c.bf16 %v1644_v17, %v1643_v16  ;;  %v3210_v16 = vld [vmem:[%s4340_s9 + $0x60] sm:$0xff]  }
 0x53c   : > { %v1657_v32 = vpack.c.bf16 %v1642_v19, %v1641_v18  ;;  %v3211_v17 = vld [vmem:[%s4340_s9 + $0x20] sm:$0xff]   ;;  %v3212_v18 = vld [vmem:[%s4340_s9 + $0x68] sm:$0xff]  }
 0x53d   : > { %v4127_v19 = vld [vmem:[%s4341_s10 + $0x5] ss:$0 sm:$0xff] }
 0x53e   : > { %3031 = vmatprep.mubr.bf16.mxu1 %v1657_v32 }
 0x53f   : > { %3032 = vmatmul.mubr.bf16.vlgmr.msra.gmra.mrb[48].mxu1 %v1658_v21 }
 0x540   : > { %3055 = vmatpush3.bf16.msra.mxu1 %v3203_v10 }
 0x541   : > { %3048 = vmatprep.subr.bf16.mxu1 %v3204_v12 }
 0x544   : > { %v3005_v29 = vpop.f32.mrb[52].mxu0  ;;  %3056 = vmatpush3.bf16.msra.mxu1 %v3205_v5 }
 0x545   : > { %v1603_v37 = vadd.f32 %v3005_v29, %v1512_v7  ;;  %v1594_v44 = vpop.f32.mrb[53].mxu0  ;;  %3049 = vmatprep.subr.bf16.mxu1 %v3206_v15 }
 0x546   : > { %v1595_v22 = vadd.f32 %v1594_v44, %v1512_v7  ;;  %v3006_v23 = vpop.f32.mrb[54].mxu0 }
 0x547   : > { %v1606_v24 = vadd.f32 %v3006_v23, %v1512_v7  ;;  %v1597_v25 = vpop.f32.mrb[55].mxu0  ;;  %v1647_v27 = vmax.f32 %v1603_v37, 0.0 }
 0x548   : > { %v1598_v26 = vadd.f32 %v1597_v25, %v1512_v7  ;;  %v1645_v41 = vmax.f32 %v1595_v22, 0.0  ;;  %3057 = vmatpush3.bf16.msra.mxu1 %v3207_v2 }
 0x549   : > { %v1648_v61 = vmax.f32 %v1606_v24, 0.0  ;;  %3050 = vmatprep.subr.bf16.mxu1 %v3208_v13 }
 0x54a   : > { %v1646_v8 = vmax.f32 %v1598_v26, 0.0 }
 0x54b   : > { %v1660_v4 = vpack.c.bf16 %v1648_v61, %v1647_v27 }
 0x54c   : > { %v1659_v14 = vpack.c.bf16 %v1646_v8, %v1645_v41  ;;  %3058 = vmatpush3.bf16.msra.mxu1 %v3209_v11 }
 0x54d   : > { %3051 = vmatprep.subr.bf16.mxu1 %v3210_v16 }
 0x54e   : > { %3035 = vmatprep.mubr.bf16.mxu1 %v1659_v14 }
 0x54f   : > { %3036 = vmatmul.mubr.bf16.gmra.mrb[52].mxu1 %v1660_v4 }
 0x550   : > { %3059 = vmatpush3.bf16.msra.mxu1 %v3211_v17 }
 0x551   : > { %3052 = vmatprep.subr.bf16.mxu1 %v3212_v18 }
 0x554   : > { %v3009_v20 = vpop.f32.mrb[56].mxu0 }
 0x555   : > { %v1619_v28 = vadd.f32 %v3009_v20, %v1512_v7  ;;  %v1610_v30 = vpop.f32.mrb[57].mxu0 }
 0x556   : > { %v1611_v31 = vadd.f32 %v1610_v30, %v1512_v7  ;;  %v3010_v33 = vpop.f32.mrb[58].mxu0 }
 0x557   : > { %v1622_v34 = vadd.f32 %v3010_v33, %v1512_v7  ;;  %v1613_v35 = vpop.f32.mrb[59].mxu0  ;;  %v1651_v38 = vmax.f32 %v1619_v28, 0.0 }
 0x558   : > { %v1614_v36 = vadd.f32 %v1613_v35, %v1512_v7  ;;  %v1649_v40 = vmax.f32 %v1611_v31, 0.0 }
 0x559   : > { %v1652_v39 = vmax.f32 %v1622_v34, 0.0 }
 0x55a   : > { %v1650_v42 = vmax.f32 %v1614_v36, 0.0 }
 0x55b   : > { %v1662_v46 = vpack.c.bf16 %v1652_v39, %v1651_v38 }
 0x55c   : > { %v1661_v47 = vpack.c.bf16 %v1650_v42, %v1649_v40 }
 0x55e   : > { %3039 = vmatprep.mubr.bf16.mxu1 %v1661_v47 }
 0x55f   : > { %3040 = vmatmul.mubr.bf16.gmra.mrb[56].mxu1 %v1662_v46 }
 0x564   : > { %v3013_v55 = vpop.f32.mrb[60].mxu0 }
 0x565   : > { %v1635_v56 = vadd.f32 %v3013_v55, %v1512_v7  ;;  %v1626_v50 = vpop.f32.mrb[61].mxu0 }
 0x566   : > { %v1627_v53 = vadd.f32 %v1626_v50, %v1512_v7  ;;  %v3014_v57 = vpop.f32.mrb[62].mxu0 }
 0x567   : > { %v1638_v58 = vadd.f32 %v3014_v57, %v1512_v7  ;;  %v1629_v59 = vpop.f32.mrb[63].mxu0  ;;  %v1655_v62 = vmax.f32 %v1635_v56, 0.0 }
 0x568   : > { %v1630_v60 = vadd.f32 %v1629_v59, %v1512_v7  ;;  %v1653_v1 = vmax.f32 %v1627_v53, 0.0  ;;  %v3199_v7 = vld [vmem:[%s4339_s8 + $0x70] ss:$8 sps:$4 sm:$0xff]  }
 0x569   : > { %v1656_v63 = vmax.f32 %v1638_v58, 0.0  ;;  %1975 = vmatpush1.bf16.msra.mxu0 %v3199_v7 }
 0x56a   : > { %v1654_v45 = vmax.f32 %v1630_v60, 0.0  ;;  %2869 = vmatprep.subr.bf16.mxu0 %v3202_v9 }
 0x56b   : > { %v1664_v49 = vpack.c.bf16 %v1656_v63, %v1655_v62 }
 0x56c   : > { %v1663_v43 = vpack.c.bf16 %v1654_v45, %v1653_v1 }
 0x56e   : > { %3043 = vmatprep.mubr.bf16.mxu1 %v1663_v43 }
 0x56f   : > { %3044 = vmatmul.mubr.bf16.gmra.mrb[60].mxu1 %v1664_v49 }
 0x612   : > { %v3033_v21 = vpop.f32.mrb[48].mxu1 }
 0x613   : > { %v1773_v32 = vadd.f32 %v3033_v21, %v4127_v19  ;;  %v1764_v29 = vpop.f32.mrb[49].mxu1  ;;  %v2709_v21 = vld [vmem:[%s4341_s10 + $0x6] ss:$8 sm:$0x3] }
 0x614   : > { %v1765_v37 = vadd.f32 %v1764_v29, %v4127_v19  ;;  %v3034_v44 = vpop.f32.mrb[50].mxu1  ;;  %v4176_v29 = vrot.slane %v2709_v21, %v475_v54 }
 0x615   : > { %v1776_v22 = vadd.f32 %v3034_v44, %v4127_v19  ;;  %v1767_v23 = vpop.f32.mrb[51].mxu1  ;;  %v1829_v25 = vmax.f32 %v1773_v32, 0.0  ;;  %v4172_v32 = vrot.slane %v2709_v21, %v471_v52 }
 0x616   : > { %v1768_v24 = vadd.f32 %v1767_v23, %v4127_v19  ;;  %v1827_v27 = vmax.f32 %v1765_v37, 0.0 }
 0x617   : > { %v1830_v26 = vmax.f32 %v1776_v22, 0.0 }
 0x618   : > { %v1828_v61 = vmax.f32 %v1768_v24, 0.0 }
 0x619   : > { %v1844_v41 = vpack.c.bf16 %v1830_v26, %v1829_v25 }
 0x61a   : > { %v1843_v8 = vpack.c.bf16 %v1828_v61, %v1827_v27 }
 0x61c   : > { %1993 = vmatmul.mubr.bf16.vlgmr.msra.gmra.mrb[64].mxu0 %v1843_v8 }
 0x61d   : > { %2002 = vmatprep.mubr.bf16.mxu0 %v3384_v0  ;;  %2870 = vmatpush3.bf16.msra.mxu0 %v3203_v10 }
 0x61e   : > { %2871 = vmatprep.subr.bf16.mxu0 %v3204_v12 }
 0x621   : > { %2872 = vmatpush3.bf16.msra.mxu0 %v3205_v5 }
 0x622   : > { %v3037_v4 = vpop.f32.mrb[52].mxu1  ;;  %2873 = vmatprep.subr.bf16.mxu0 %v3206_v15 }
 0x623   : > { %v1789_v14 = vadd.f32 %v3037_v4, %v4127_v19  ;;  %v1780_v20 = vpop.f32.mrb[53].mxu1 }
 0x624   : > { %v1781_v28 = vadd.f32 %v1780_v20, %v4127_v19  ;;  %v3038_v30 = vpop.f32.mrb[54].mxu1  ;;  %2003 = vmatmul.mubr.bf16.gmra.mrb[68].mxu0 %v1844_v41 }
 0x625   : > { %v1792_v31 = vadd.f32 %v3038_v30, %v4127_v19  ;;  %v1783_v33 = vpop.f32.mrb[55].mxu1  ;;  %2012 = vmatprep.mubr.bf16.mxu0 %v3384_v0  ;;  %2874 = vmatpush3.bf16.msra.mxu0 %v3207_v2  ;;  %v1833_v35 = vmax.f32 %v1789_v14, 0.0 }
 0x626   : > { %v1784_v34 = vadd.f32 %v1783_v33, %v4127_v19  ;;  %2875 = vmatprep.subr.bf16.mxu0 %v3208_v13  ;;  %v1831_v38 = vmax.f32 %v1781_v28, 0.0 }
 0x627   : > { %v1834_v36 = vmax.f32 %v1792_v31, 0.0 }
 0x628   : > { %v1832_v39 = vmax.f32 %v1784_v34, 0.0 }
 0x629   : > { %v1846_v40 = vpack.c.bf16 %v1834_v36, %v1833_v35  ;;  %2876 = vmatpush3.bf16.msra.mxu0 %v3209_v11 }
 0x62a   : > { %v1845_v42 = vpack.c.bf16 %v1832_v39, %v1831_v38  ;;  %2877 = vmatprep.subr.bf16.mxu0 %v3210_v16  ;;  %v3213_v16 = vld [vmem:[%s4340_s9 + $0x28] sm:$0xff]  }
 0x62b   : > { %3060 = vmatpush3.bf16.msra.mxu1 %v3213_v16 }
 0x62c   : > { %2013 = vmatmul.mubr.bf16.gmra.mrb[72].mxu0 %v1845_v42 }
 0x62d   : > { %2022 = vmatprep.mubr.bf16.mxu0 %v3384_v0  ;;  %2878 = vmatpush3.bf16.msra.mxu0 %v3211_v17  ;;  %v3214_v17 = vld [vmem:[%s4340_s9 + $0x70] sm:$0xff]  }
 0x62e   : > { %2879 = vmatprep.subr.bf16.mxu0 %v3212_v18  ;;  %v3215_v18 = vld [vmem:[%s4340_s9 + $0x30] sm:$0xff]   ;;  %3053 = vmatprep.subr.bf16.mxu1 %v3214_v17 }
 0x62f   : > { %3061 = vmatpush3.bf16.msra.mxu1 %v3215_v18 }
 0x631   : > { %2880 = vmatpush3.bf16.msra.mxu0 %v3213_v16 }
 0x632   : > { %v3041_v46 = vpop.f32.mrb[56].mxu1  ;;  %2881 = vmatprep.subr.bf16.mxu0 %v3214_v17 }
 0x633   : > { %v1805_v47 = vadd.f32 %v3041_v46, %v4127_v19  ;;  %v1796_v55 = vpop.f32.mrb[57].mxu1 }
 0x634   : > { %v1797_v56 = vadd.f32 %v1796_v55, %v4127_v19  ;;  %v3042_v50 = vpop.f32.mrb[58].mxu1  ;;  %2023 = vmatmul.mubr.bf16.gmra.mrb[76].mxu0 %v1846_v40 }
 0x635   : > { %v1808_v53 = vadd.f32 %v3042_v50, %v4127_v19  ;;  %v1799_v57 = vpop.f32.mrb[59].mxu1  ;;  %2032 = vmatprep.mubr.bf16.mxu0 %v3384_v0  ;;  %v1837_v59 = vmax.f32 %v1805_v47, 0.0  ;;  %2882 = vmatpush3.bf16.msra.mxu0 %v3215_v18 }
 0x636   : > { %v1800_v58 = vadd.f32 %v1799_v57, %v4127_v19  ;;  %v1835_v62 = vmax.f32 %v1797_v56, 0.0 }
 0x637   : > { %v1838_v60 = vmax.f32 %v1808_v53, 0.0 }
 0x638   : > { %v1836_v63 = vmax.f32 %v1800_v58, 0.0 }
 0x639   : > { %v1848_v1 = vpack.c.bf16 %v1838_v60, %v1837_v59 }
 0x63a   : > { %v1847_v45 = vpack.c.bf16 %v1836_v63, %v1835_v62 }
 0x63c   : > { %2033 = vmatmul.mubr.bf16.gmra.mrb[80].mxu0 %v1847_v45 }
 0x63d   : > { %2042 = vmatprep.mubr.bf16.mxu0 %v3384_v0 }
 0x642   : > { %v3045_v49 = vpop.f32.mrb[60].mxu1 }
 0x643   : > { %v1821_v43 = vadd.f32 %v3045_v49, %v4127_v19  ;;  %v1812_v48 = vpop.f32.mrb[61].mxu1 }
 0x644   : > { %v1813_v3 = vadd.f32 %v1812_v48, %v4127_v19  ;;  %v3046_v6 = vpop.f32.mrb[62].mxu1  ;;  %2043 = vmatmul.mubr.bf16.gmra.mrb[84].mxu0 %v1848_v1 }
 0x645   : > { %v1824_v7 = vadd.f32 %v3046_v6, %v4127_v19  ;;  %v1815_v9 = vpop.f32.mrb[63].mxu1  ;;  %2052 = vmatprep.mubr.bf16.mxu0 %v3384_v0  ;;  %v1841_v12 = vmax.f32 %v1821_v43, 0.0 }
 0x646   : > { %v1816_v10 = vadd.f32 %v1815_v9, %v4127_v19  ;;  %v1839_v15 = vmax.f32 %v1813_v3, 0.0  ;;  %v3217_v19 = vld [vmem:[%s4340_s9 + $0x38] sm:$0xff]  }
 0x647   : > { %v1842_v5 = vmax.f32 %v1824_v7, 0.0 }
 0x648   : > { %v1840_v2 = vmax.f32 %v1816_v10, 0.0 }
 0x649   : > { %v1850_v13 = vpack.c.bf16 %v1842_v5, %v1841_v12 }
 0x64a   : > { %v1849_v11 = vpack.c.bf16 %v1840_v2, %v1839_v15 }
 0x64c   : > { %2053 = vmatmul.mubr.bf16.gmra.mrb[88].mxu0 %v1849_v11 }
 0x64d   : > { %2062 = vmatprep.mubr.bf16.mxu0 %v3384_v0  ;;  %v3216_v0 = vld [vmem:[%s4340_s9 + $0x78] sm:$0xff]  }
 0x64e   : > { %2883 = vmatprep.subr.bf16.mxu0 %v3216_v0  ;;  %3054 = vmatprep.subr.bf16.mxu1 %v3216_v0 }
 0x64f   : > { %2884 = vmatpush3.bf16.msra.mxu0 %v3217_v19  ;;  %3062 = vmatpush3.bf16.msra.mxu1 %v3217_v19 }
 0x654   : > { %2063 = vmatmul.mubr.bf16.gmra.mrb[92].mxu0 %v1850_v13 }
 0x6ef   : > { %v1994_v37 = vpop.f32.mrb[64].mxu0 }
 0x6f0   : > { %v1995_v44 = vadd.f32 %v1994_v37, %v4172_v32  ;;  %v1996_v22 = vpop.f32.mrb[65].mxu0 }
 0x6f1   : > { %v1997_v23 = vadd.f32 %v1996_v22, %v4176_v29  ;;  %v1998_v24 = vpop.f32.mrb[66].mxu0 }
 0x6f2   : > { %v1999_v25 = vadd.f32 %v1998_v24, %v4172_v32  ;;  %v2000_v26 = vpop.f32.mrb[67].mxu0  ;;  %v2073_v61 = vmax.f32 %v1995_v44, 0.0 }
 0x6f3   : > { %v2001_v27 = vadd.f32 %v2000_v26, %v4176_v29  ;;  %v2074_v52 = vmax.f32 %v1997_v23, 0.0 }
 0x6f4   : > { %v2075_v41 = vmax.f32 %v1999_v25, 0.0 }
 0x6f5   : > { %v2076_v8 = vmax.f32 %v2001_v27, 0.0 }
 0x6f6   : > { %v2105_v4 = vpack.c.bf16 %v2075_v41, %v2073_v61 }
 0x6f7   : > { %v2106_v51 = vpack.c.bf16 %v2076_v8, %v2074_v52  ;;  %v2004_v54 = vpop.f32.mrb[68].mxu0 }
 0x6f8   : > { %v2005_v14 = vadd.f32 %v2004_v54, %v4172_v32  ;;  %v2006_v20 = vpop.f32.mrb[69].mxu0 }
 0x6f9   : > { %v2007_v28 = vadd.f32 %v2006_v20, %v4176_v29  ;;  %v2008_v30 = vpop.f32.mrb[70].mxu0  ;;  %2282 = vmatprep.mubr.bf16.mxu0 %v2106_v51 }
 0x6fa   : > { %v2009_v31 = vadd.f32 %v2008_v30, %v4172_v32  ;;  %v2010_v33 = vpop.f32.mrb[71].mxu0  ;;  %2283 = vmatmul.mubr.bf16.vlgmr.msra.gmra.mrb[96].mxu0 %v2105_v4  ;;  %v2077_v35 = vmax.f32 %v2005_v14, 0.0 }
 0x6fb   : > { %v2011_v34 = vadd.f32 %v2010_v33, %v4176_v29  ;;  %v2078_v38 = vmax.f32 %v2007_v28, 0.0 }
 0x6fc   : > { %v2079_v36 = vmax.f32 %v2009_v31, 0.0 }
 0x6fd   : > { %v2080_v39 = vmax.f32 %v2011_v34, 0.0 }
 0x6fe   : > { %v2107_v40 = vpack.c.bf16 %v2079_v36, %v2077_v35 }
 0x6ff   : > { %v2108_v42 = vpack.c.bf16 %v2080_v39, %v2078_v38  ;;  %v2014_v46 = vpop.f32.mrb[72].mxu0 }
 0x700   : > { %v2015_v47 = vadd.f32 %v2014_v46, %v4172_v32  ;;  %v2016_v55 = vpop.f32.mrb[73].mxu0 }
 0x701   : > { %v2017_v56 = vadd.f32 %v2016_v55, %v4176_v29  ;;  %v2018_v50 = vpop.f32.mrb[74].mxu0  ;;  %2290 = vmatprep.mubr.bf16.mxu1 %v2108_v42 }
 0x702   : > { %v2019_v53 = vadd.f32 %v2018_v50, %v4172_v32  ;;  %v2020_v57 = vpop.f32.mrb[75].mxu0  ;;  %2291 = vmatmul.mubr.bf16.vlgmr.msra.gmra.mrb[64].mxu1 %v2107_v40  ;;  %v2081_v59 = vmax.f32 %v2015_v47, 0.0 }
 0x703   : > { %v2021_v58 = vadd.f32 %v2020_v57, %v4176_v29  ;;  %v2082_v62 = vmax.f32 %v2017_v56, 0.0 }
 0x704   : > { %v2083_v60 = vmax.f32 %v2019_v53, 0.0 }
 0x705   : > { %v2084_v63 = vmax.f32 %v2021_v58, 0.0 }
 0x706   : > { %v2109_v1 = vpack.c.bf16 %v2083_v60, %v2081_v59 }
 0x707   : > { %v2110_v45 = vpack.c.bf16 %v2084_v63, %v2082_v62  ;;  %v2024_v49 = vpop.f32.mrb[76].mxu0 }
 0x708   : > { %v2025_v43 = vadd.f32 %v2024_v49, %v4172_v32  ;;  %v2026_v48 = vpop.f32.mrb[77].mxu0 }
 0x709   : > { %v2027_v3 = vadd.f32 %v2026_v48, %v4176_v29  ;;  %v2028_v6 = vpop.f32.mrb[78].mxu0  ;;  %2298 = vmatprep.mubr.bf16.mxu1 %v2110_v45 }
 0x70a   : > { %v2029_v7 = vadd.f32 %v2028_v6, %v4172_v32  ;;  %v2030_v9 = vpop.f32.mrb[79].mxu0  ;;  %2299 = vmatmul.mubr.bf16.gmra.mrb[68].mxu1 %v2109_v1  ;;  %v2085_v12 = vmax.f32 %v2025_v43, 0.0 }
 0x70b   : > { %v2031_v10 = vadd.f32 %v2030_v9, %v4176_v29  ;;  %v2086_v15 = vmax.f32 %v2027_v3, 0.0 }
 0x70c   : > { %v2087_v5 = vmax.f32 %v2029_v7, 0.0 }
 0x70d   : > { %v2088_v2 = vmax.f32 %v2031_v10, 0.0 }
 0x70e   : > { %v2111_v13 = vpack.c.bf16 %v2087_v5, %v2085_v12  ;;  %v4213_v5 = vld [vmem:[%s4341_s10 + $0x7] ss:$0 sm:$0xff] }
 0x70f   : > { %v2112_v11 = vpack.c.bf16 %v2088_v2, %v2086_v15  ;;  %v2034_v16 = vpop.f32.mrb[80].mxu0 }
 0x710   : > { %v2035_v17 = vadd.f32 %v2034_v16, %v4172_v32  ;;  %v2036_v18 = vpop.f32.mrb[81].mxu0 }
 0x711   : > { %v2037_v0 = vadd.f32 %v2036_v18, %v4176_v29  ;;  %v2038_v19 = vpop.f32.mrb[82].mxu0  ;;  %2306 = vmatprep.mubr.bf16.mxu1 %v2112_v11 }
 0x712   : > { %v2039_v21 = vadd.f32 %v2038_v19, %v4172_v32  ;;  %v2040_v37 = vpop.f32.mrb[83].mxu0  ;;  %2307 = vmatmul.mubr.bf16.gmra.mrb[72].mxu1 %v2111_v13  ;;  %v2089_v22 = vmax.f32 %v2035_v17, 0.0 }
 0x713   : > { %v2041_v44 = vadd.f32 %v2040_v37, %v4176_v29  ;;  %v2090_v24 = vmax.f32 %v2037_v0, 0.0 }
 0x714   : > { %v2091_v23 = vmax.f32 %v2039_v21, 0.0 }
 0x715   : > { %v2092_v25 = vmax.f32 %v2041_v44, 0.0 }
 0x716   : > { %v2113_v26 = vpack.c.bf16 %v2091_v23, %v2089_v22 }
 0x717   : > { %v2114_v27 = vpack.c.bf16 %v2092_v25, %v2090_v24  ;;  %v2044_v61 = vpop.f32.mrb[84].mxu0 }
 0x718   : > { %v2045_v41 = vadd.f32 %v2044_v61, %v4172_v32  ;;  %v2046_v52 = vpop.f32.mrb[85].mxu0 }
 0x719   : > { %v2047_v8 = vadd.f32 %v2046_v52, %v4176_v29  ;;  %v2048_v4 = vpop.f32.mrb[86].mxu0  ;;  %2314 = vmatprep.mubr.bf16.mxu1 %v2114_v27 }
 0x71a   : > { %v2049_v51 = vadd.f32 %v2048_v4, %v4172_v32  ;;  %v2050_v54 = vpop.f32.mrb[87].mxu0  ;;  %2315 = vmatmul.mubr.bf16.gmra.mrb[76].mxu1 %v2113_v26  ;;  %v2093_v20 = vmax.f32 %v2045_v41, 0.0 }
 0x71b   : > { %v2051_v14 = vadd.f32 %v2050_v54, %v4176_v29  ;;  %v2094_v30 = vmax.f32 %v2047_v8, 0.0 }
 0x71c   : > { %v2095_v28 = vmax.f32 %v2049_v51, 0.0 }
 0x71d   : > { %v2096_v31 = vmax.f32 %v2051_v14, 0.0 }
 0x71e   : > { %v2115_v33 = vpack.c.bf16 %v2095_v28, %v2093_v20 }
 0x71f   : > { %v2116_v34 = vpack.c.bf16 %v2096_v31, %v2094_v30  ;;  %v2054_v35 = vpop.f32.mrb[88].mxu0 }
 0x720   : > { %v2055_v36 = vadd.f32 %v2054_v35, %v4172_v32  ;;  %v2056_v38 = vpop.f32.mrb[89].mxu0 }
 0x721   : > { %v2057_v39 = vadd.f32 %v2056_v38, %v4176_v29  ;;  %v2058_v40 = vpop.f32.mrb[90].mxu0  ;;  %2322 = vmatprep.mubr.bf16.mxu1 %v2116_v34 }
 0x722   : > { %v2059_v42 = vadd.f32 %v2058_v40, %v4172_v32  ;;  %v2060_v46 = vpop.f32.mrb[91].mxu0  ;;  %2323 = vmatmul.mubr.bf16.gmra.mrb[80].mxu1 %v2115_v33  ;;  %v2097_v55 = vmax.f32 %v2055_v36, 0.0 }
 0x723   : > { %v2061_v47 = vadd.f32 %v2060_v46, %v4176_v29  ;;  %v2098_v50 = vmax.f32 %v2057_v39, 0.0 }
 0x724   : > { %v2099_v56 = vmax.f32 %v2059_v42, 0.0 }
 0x725   : > { %v2100_v53 = vmax.f32 %v2061_v47, 0.0 }
 0x726   : > { %v2117_v57 = vpack.c.bf16 %v2099_v56, %v2097_v55 }
 0x727   : > { %v2118_v58 = vpack.c.bf16 %v2100_v53, %v2098_v50  ;;  %v2064_v59 = vpop.f32.mrb[92].mxu0 }
 0x728   : > { %v2065_v60 = vadd.f32 %v2064_v59, %v4172_v32  ;;  %v2066_v62 = vpop.f32.mrb[93].mxu0 }
 0x729   : > { %v2067_v63 = vadd.f32 %v2066_v62, %v4176_v29  ;;  %v2068_v1 = vpop.f32.mrb[94].mxu0  ;;  %2330 = vmatprep.mubr.bf16.mxu1 %v2118_v58 }
 0x72a   : > { %v2069_v45 = vadd.f32 %v2068_v1, %v4172_v32  ;;  %v2070_v49 = vpop.f32.mrb[95].mxu0  ;;  %2331 = vmatmul.mubr.bf16.gmra.mrb[84].mxu1 %v2117_v57  ;;  %v2101_v48 = vmax.f32 %v2065_v60, 0.0 }
 0x72b   : > { %v2071_v43 = vadd.f32 %v2070_v49, %v4176_v29  ;;  %v2102_v6 = vmax.f32 %v2067_v63, 0.0 }
 0x72c   : > { %v2103_v3 = vmax.f32 %v2069_v45, 0.0 }
 0x72d   : > { %v2104_v7 = vmax.f32 %v2071_v43, 0.0 }
 0x72e   : > { %v2119_v9 = vpack.c.bf16 %v2103_v3, %v2101_v48 }
 0x72f   : > { %v2120_v10 = vpack.c.bf16 %v2104_v7, %v2102_v6 }
 0x731   : > { %2338 = vmatprep.mubr.bf16.mxu1 %v2120_v10 }
 0x732   : > { %2339 = vmatmul.mubr.bf16.gmra.mrb[88].mxu1 %v2119_v9 }
 0x7cd   : > { %v2885_v12 = vpop.f32.mrb[96].mxu0 }
 0x7ce   : > { %v2886_v15 = vpop.f32.mrb[97].mxu0 }
 0x7cf   : > { %v2887_v32 = vadd.f32 %v2886_v15, %v2885_v12  ;;  %v2888_v2 = vpop.f32.mrb[98].mxu0 }
 0x7d0   : > { %v2889_v13 = vpop.f32.mrb[99].mxu0 }
 0x7d1   : > { %v2285_v29 = vadd.f32 %v2887_v32, %v4213_v5  ;;  %v2890_v11 = vadd.f32 %v2889_v13, %v2888_v2 }
 0x7d3   : > { %v2288_v16 = vadd.f32 %v2890_v11, %v4213_v5  ;;  %2461 = vrot.lane.b32.xlu0 %v2285_v29, %s3388_s22 }
 0x7d5   : > { %v2891_v17 = vpop.f32.mrb[64].mxu1  ;;  %2463 = vrot.lane.b32.xlu1 %v2288_v16, %s3388_s22 }
 0x7d6   : > { %v2892_v18 = vpop.f32.mrb[65].mxu1 }
 0x7d7   : > { %v2893_v0 = vadd.f32 %v2892_v18, %v2891_v17  ;;  %v2894_v19 = vpop.f32.mrb[66].mxu1 }
 0x7d8   : > { %v2895_v21 = vpop.f32.mrb[67].mxu1 }
 0x7d9   : > { %v2293_v37 = vadd.f32 %v2893_v0, %v4213_v5  ;;  %v2896_v44 = vadd.f32 %v2895_v21, %v2894_v19 }
 0x7db   : > { %v2296_v22 = vadd.f32 %v2896_v44, %v4213_v5  ;;  %2465 = vrot.lane.b32.xlu0 %v2293_v37, %s3388_s22 }
 0x7dd   : > { %v2897_v23 = vpop.f32.mrb[68].mxu1  ;;  %2467 = vrot.lane.b32.xlu1 %v2296_v22, %s3388_s22 }
 0x7de   : > { %v2898_v24 = vpop.f32.mrb[69].mxu1 }
 0x7df   : > { %v2899_v25 = vadd.f32 %v2898_v24, %v2897_v23  ;;  %v2900_v26 = vpop.f32.mrb[70].mxu1 }
 0x7e0   : > { %v2901_v27 = vpop.f32.mrb[71].mxu1 }
 0x7e1   : > { %v2301_v61 = vadd.f32 %v2899_v25, %v4213_v5  ;;  %v2902_v41 = vadd.f32 %v2901_v27, %v2900_v26 }
 0x7e3   : > { %v2304_v52 = vadd.f32 %v2902_v41, %v4213_v5  ;;  %2469 = vrot.lane.b32.xlu0 %v2301_v61, %s3388_s22 }
 0x7e5   : > { %v2903_v8 = vpop.f32.mrb[72].mxu1  ;;  %2471 = vrot.lane.b32.xlu1 %v2304_v52, %s3388_s22 }
 0x7e6   : > { %v2904_v4 = vpop.f32.mrb[73].mxu1 }
 0x7e7   : > { %v2905_v51 = vadd.f32 %v2904_v4, %v2903_v8  ;;  %v2906_v54 = vpop.f32.mrb[74].mxu1 }
 0x7e8   : > { %v2907_v14 = vpop.f32.mrb[75].mxu1 }
 0x7e9   : > { %v2309_v20 = vadd.f32 %v2905_v51, %v4213_v5  ;;  %v2908_v28 = vadd.f32 %v2907_v14, %v2906_v54 }
 0x7eb   : > { %v2312_v30 = vadd.f32 %v2908_v28, %v4213_v5  ;;  %2473 = vrot.lane.b32.xlu0 %v2309_v20, %s3388_s22 }
 0x7ed   : > { %v2909_v31 = vpop.f32.mrb[76].mxu1  ;;  %2475 = vrot.lane.b32.xlu1 %v2312_v30, %s3388_s22 }
 0x7ee   : > { %v2910_v33 = vpop.f32.mrb[77].mxu1 }
 0x7ef   : > { %v2911_v34 = vadd.f32 %v2910_v33, %v2909_v31  ;;  %v2912_v35 = vpop.f32.mrb[78].mxu1 }
 0x7f0   : > { %v2913_v36 = vpop.f32.mrb[79].mxu1 }
 0x7f1   : > { %v2317_v38 = vadd.f32 %v2911_v34, %v4213_v5  ;;  %v2914_v39 = vadd.f32 %v2913_v36, %v2912_v35 }
 0x7f3   : > { %v2320_v40 = vadd.f32 %v2914_v39, %v4213_v5  ;;  %2477 = vrot.lane.b32.xlu0 %v2317_v38, %s3388_s22 }
 0x7f5   : > { %v2915_v42 = vpop.f32.mrb[80].mxu1  ;;  %2479 = vrot.lane.b32.xlu1 %v2320_v40, %s3388_s22 }
 0x7f6   : > { %v2916_v46 = vpop.f32.mrb[81].mxu1 }
 0x7f7   : > { %v2917_v47 = vadd.f32 %v2916_v46, %v2915_v42  ;;  %v2918_v55 = vpop.f32.mrb[82].mxu1 }
 0x7f8   : > { %v2919_v56 = vpop.f32.mrb[83].mxu1 }
 0x7f9   : > { %v2325_v50 = vadd.f32 %v2917_v47, %v4213_v5  ;;  %v2920_v53 = vadd.f32 %v2919_v56, %v2918_v55 }
 0x7fb   : > { %v2328_v57 = vadd.f32 %v2920_v53, %v4213_v5  ;;  %2481 = vrot.lane.b32.xlu0 %v2325_v50, %s3388_s22 }
 0x7fd   : > { %2483 = vrot.lane.b32.xlu1 %v2328_v57, %s3388_s22  ;;  %v2921_v58 = vpop.f32.mrb[84].mxu1 }
 0x7fe   : > { %v2922_v59 = vpop.f32.mrb[85].mxu1 }
 0x7ff   : > { %v2923_v60 = vadd.f32 %v2922_v59, %v2921_v58  ;;  %v2924_v62 = vpop.f32.mrb[86].mxu1 }
 0x800   : > { %v2925_v63 = vpop.f32.mrb[87].mxu1 }
 0x801   : > { %v2333_v1 = vadd.f32 %v2923_v60, %v4213_v5  ;;  %v2926_v45 = vadd.f32 %v2925_v63, %v2924_v62 }
 0x803   : > { %v2336_v49 = vadd.f32 %v2926_v45, %v4213_v5  ;;  %2485 = vrot.lane.b32.xlu0 %v2333_v1, %s3388_s22 }
 0x805   : > { %v2927_v43 = vpop.f32.mrb[88].mxu1  ;;  %2487 = vrot.lane.b32.xlu1 %v2336_v49, %s3388_s22 }
 0x806   : > { %v2928_v48 = vpop.f32.mrb[89].mxu1 }
 0x807   : > { %v2929_v3 = vadd.f32 %v2928_v48, %v2927_v43  ;;  %v2930_v6 = vpop.f32.mrb[90].mxu1 }
 0x808   : > { %v2931_v7 = vpop.f32.mrb[91].mxu1 }
 0x809   : > { %v2341_v9 = vadd.f32 %v2929_v3, %v4213_v5  ;;  %v2932_v10 = vadd.f32 %v2931_v7, %v2930_v6 }
 0x80b   : > { %v2344_v12 = vadd.f32 %v2932_v10, %v4213_v5  ;;  %2489 = vrot.lane.b32.xlu0 %v2341_v9, %s3388_s22 }
 0x80d   : > { %2491 = vrot.lane.b32.xlu1 %v2344_v12, %s3388_s22 }
 0x845   : > { %v2462_v15 = vpop.permute.xlu0 %2461 }
 0x846   : > { %2510 = vst.msk [vmem:[%s3820_s26] sm:$0xff] %vm2509_vm5, %v2462_v15 }
 0x847   : > { %v2464_v32 = vpop.permute.xlu1 %2463 }
 0x848   : > { %2511 = vst.msk [vmem:[%s3820_s26 + $0x8] sm:$0xff] %vm2509_vm5, %v2464_v32 }
 0x84d   : > { %v2466_v2 = vpop.permute.xlu0 %2465 }
 0x84e   : > { %2512 = vst.msk [vmem:[%s3820_s26 + $0x10] sm:$0xff] %vm2509_vm5, %v2466_v2 }
 0x84f   : > { %v2468_v5 = vpop.permute.xlu1 %2467 }
 0x850   : > { %2513 = vst.msk [vmem:[%s3820_s26 + $0x18] sm:$0xff] %vm2509_vm5, %v2468_v5 }
 0x855   : > { %v2470_v13 = vpop.permute.xlu0 %2469 }
 0x856   : > { %2514 = vst.msk [vmem:[%s3820_s26 + $0x20] sm:$0xff] %vm2509_vm5, %v2470_v13 }
 0x857   : > { %v2472_v29 = vpop.permute.xlu1 %2471 }
 0x858   : > { %2515 = vst.msk [vmem:[%s3820_s26 + $0x28] sm:$0xff] %vm2509_vm5, %v2472_v29 }
 0x85d   : > { %v2474_v11 = vpop.permute.xlu0 %2473 }
 0x85e   : > { %2516 = vst.msk [vmem:[%s3820_s26 + $0x30] sm:$0xff] %vm2509_vm5, %v2474_v11 }
 0x85f   : > { %v2476_v16 = vpop.permute.xlu1 %2475 }
 0x860   : > { %2517 = vst.msk [vmem:[%s3820_s26 + $0x38] sm:$0xff] %vm2509_vm5, %v2476_v16 }
 0x865   : > { %v2478_v17 = vpop.permute.xlu0 %2477 }
 0x866   : > { %2518 = vst.msk [vmem:[%s3820_s26 + $0x40] sm:$0xff] %vm2509_vm5, %v2478_v17 }
 0x867   : > { %v2480_v18 = vpop.permute.xlu1 %2479 }
 0x868   : > { %2519 = vst.msk [vmem:[%s3820_s26 + $0x48] sm:$0xff] %vm2509_vm5, %v2480_v18 }
 0x86d   : > { %v2482_v0 = vpop.permute.xlu0 %2481 }
 0x86e   : > { %2520 = vst.msk [vmem:[%s3820_s26 + $0x50] sm:$0xff] %vm2509_vm5, %v2482_v0 }
 0x86f   : > { %v2484_v19 = vpop.permute.xlu1 %2483 }
 0x870   : > { %2521 = vst.msk [vmem:[%s3820_s26 + $0x58] sm:$0xff] %vm2509_vm5, %v2484_v19 }
 0x875   : > { %v2486_v21 = vpop.permute.xlu0 %2485 }
 0x876   : > { %2522 = vst.msk [vmem:[%s3820_s26 + $0x60] sm:$0xff] %vm2509_vm5, %v2486_v21 }
 0x877   : > { %v2488_v37 = vpop.permute.xlu1 %2487 }
 0x878   : > { %2523 = vst.msk [vmem:[%s3820_s26 + $0x68] sm:$0xff] %vm2509_vm5, %v2488_v37 }
 0x87d   : > { %v2490_v44 = vpop.permute.xlu0 %2489 }
 0x87e   : > { %2524 = vst.msk [vmem:[%s3820_s26 + $0x70] sm:$0xff] %vm2509_vm5, %v2490_v44 }
 0x87f   : > { %v2492_v22 = vpop.permute.xlu1 %2491 }
 0x880   : > { %2525 = vst.msk [vmem:[%s3820_s26 + $0x78] sm:$0xff] %vm2509_vm5, %v2492_v22 }
 0x881   : > { %3319 = shalt.err (!%p3316_p11)
}
 0x882   : > { %s3320_s28 = scalar_lea.hbm %s4280_s19, 2048  ;;  %s3324_s16 = scalar_lea.hbm %s4342_s11, 4096 }
 0x883   : > { %p3321_p13 = scmp.ne.s32.totalorder %s4280_s19, %s3320_s28  ;;  %p3325_p6 = scmp.lt.u32.totalorder %s4280_s19, %s4342_s11 }
 0x884   : > { %p3326_p9 = scmp.lt.u32.totalorder %s3324_s16, %s3320_s28  ;;  %p3328_p10 = scmp.lt.u32.totalorder %s3320_s28, %s4280_s19 }
 0x885   : > { %p3322_p0 = pnand %p3321_p13, %p4365_p1 }
 0x886   : > { %p3327_p12 = por %p3326_p9, %p3325_p6 }
 0x887   : > { %p3323_p5 = pneg %p3322_p0 }
 0x888   : > { %p3329_p2 = por %p3328_p10, %p3327_p12 }
 0x88a   : > { %p3330_p3 = pnand %p3329_p2, %p3323_p5 }
 0x88c   : > { %3333 = shalt.err (!%p3330_p3)
}
 0x88d   : > { %s3390_s24 = smov 128   ;;  %s3391_s25 = smov 8  }
 0x88e   : > { %3071 = dma.vmem_to_hbm [thread:$0]  (%p4365_p1), %s4282_s30, 2048, %s4280_s19, %s4290_s12, %s3390_s24, %s3390_s24, %s3391_s25  }
 0x88f PF: > { %s4366_s14 = sld [smem:[#allocation11_spill]]  ;;  %s4367_s21 = sld [smem:[#allocation15_spill]] }
 0x890   : > { %p3088_p4 = scmp.ge.s32.totalorder %s3376_s20, 2 }
 0x895   : > { %s2555_s17 = sand.u32 1, %s4366_s14   ;;  %p4368_p7 = scmp.ne.s32.totalorder %s4367_s21, 0 }
 0x896   : > { %s2556_s23 = scalar_lea.sflag [#allocation4], %s2555_s17 }
 0x897   : > { %p3081_p8 = pnand %p3088_p4, %p4368_p7 }
 0x899   : > { %3359 = dma.done.wait (!%p3081_p8), %s2556_s23, 2048  }
 0x89a   : > { %3361 = vsyncadd (!%p3081_p8), %s2556_s23, 4294965248  ;;  %s4369_s20 = sld [smem:[#allocation13_spill]]  ;;  %s4370_s13 = sld [smem:[#allocation12_spill]] }
 0x89b   : > { %s4371_s19 = sld [smem:[#allocation14_spill]]  ;;  %s4372_s17 = smov %s3368_s18 }
 0x8a0   : > { %p23_p11 = scmp.ge.s32.totalorder %s4369_s20, 4   ;;  %s4373_s18 = smov %s4370_s13 }
 0x8a2   :  { %25 = sbr.rel (!%p23_p11) target bundleno = 5 (0x5), region = 112 }
 0x8a9   :  { %2561 = vsyncpa [#allocation3], 1 }
 0x8aa   :  { %2563 = vsyncpa [#allocation3 + $0x1], 1 }
 0x8ab   :  { %2564 = vsyncpa [#allocation6], 1 }
 0x8ac   :  { %2565 = vsyncpa [#allocation4], 1 }
 0x8ad   :  { %2567 = vsyncpa [#allocation4 + $0x1], 1 }

</bundles_post_ra>
